<compile_context>
chip_gen: v7x
topology: tpu7x:2x2x1
jax: 0.10.0
libtpu: 0.0.40
codegen_flags: <defaults>
</compile_context>

<pallas_src>
import math
import functools

import jax
import jax.numpy as jnp
from jax.experimental import pallas as pl
from jax.experimental.pallas import tpu as pltpu

_MM_DTYPE = jnp.bfloat16          # MXU input dtype; accumulation stays float32


# =========================== in-kernel helpers (traced inside kernels) ===========================

def _ln(x, a, b, eps):
    """Annotated-Transformer LayerNorm: unbiased std, eps added to std (float32)."""
    d = x.shape[-1]
    mean = jnp.mean(x, axis=-1, keepdims=True)
    diff = x - mean
    std = jnp.sqrt(jnp.sum(diff * diff, axis=-1, keepdims=True) / (d - 1.0))
    return a * diff / (std + eps) + b


def _mha(q, k, v, neg_mask, wo_bf, h, dk, scale):
    """Multi-head attention for one batch element.

    q: (Lq, D) f32, k/v: (Lk, D) f32, neg_mask: broadcastable to (Lq, Lk) bool
    (True => masked out), wo_bf: (D, D) bf16.
    K is transposed ONCE (not per head); per-head contexts are concatenated and the
    output projection is a single (Lq,D)@(D,D) MXU matmul.  Returns (Lq, D) f32
    WITHOUT the output-projection bias.
    """
    kT = k.T                                              # one XLU transpose per call
    heads = []
    for hh in range(h):                                   # static unroll, h is small
        sl = slice(hh * dk, (hh + 1) * dk)
        s = jnp.dot(q[:, sl].astype(_MM_DTYPE), kT[sl, :].astype(_MM_DTYPE),
                    preferred_element_type=jnp.float32) * scale
        s = jnp.where(neg_mask, jnp.float32(-1e9), s)
        s = s - jnp.max(s, axis=-1, keepdims=True)
        e = jnp.exp(s)
        # softmax denominator reciprocal on the EUP (free slot next to the exp)
        p = e * pl.reciprocal(jnp.sum(e, axis=-1, keepdims=True), approx=True)
        heads.append(jnp.dot(p.astype(_MM_DTYPE), v[:, sl].astype(_MM_DTYPE),
                             preferred_element_type=jnp.float32))
    ctx = jnp.concatenate(heads, axis=-1)                 # (Lq, D)
    return jnp.dot(ctx.astype(_MM_DTYPE), wo_bf, preferred_element_type=jnp.float32)


# =========================== fused full-stack Pallas kernels ===========================

def _encoder_stack_kernel(x_ref, smask_ref,
                          ln1a, ln1b, wqkv, bqkv, wo, bo,
                          ln2a, ln2b, w1, b1, w2, b2,
                          fna, fnb,
                          o_ref, xbuf,
                          *, B, S, h, eps):
    l = pl.program_id(0)
    n_layers = pl.num_programs(0)

    @pl.when(l == 0)
    def _():
        xbuf[...] = x_ref[...]                  # prime the VMEM-resident activation carry

    x = xbuf[...]                               # (B*S, D) float32
    D = x.shape[-1]
    dk = D // h
    scale = 1.0 / math.sqrt(dk)

    # --- self-attention sublayer (pre-norm, fused QKV over the full B*S slab) ---
    xn = _ln(x, ln1a[...], ln1b[...], eps)
    qkv = jnp.dot(xn.astype(_MM_DTYPE), wqkv[...],
                  preferred_element_type=jnp.float32) + bqkv[...]
    q, k, v = qkv[:, :D], qkv[:, D:2 * D], qkv[:, 2 * D:]
    attn = []
    for b in range(B):                          # only the masked softmax is per-batch
        rs = slice(b * S, (b + 1) * S)
        neg = jnp.broadcast_to(smask_ref[b] == 0, (S, S))
        attn.append(_mha(q[rs], k[rs], v[rs], neg, wo[...], h, dk, scale))
    x = x + jnp.concatenate(attn, axis=0) + bo[...]

    # --- position-wise FFN sublayer (pre-norm, fused residual) ---
    xn = _ln(x, ln2a[...], ln2b[...], eps)
    hid = jnp.maximum(jnp.dot(xn.astype(_MM_DTYPE), w1[...],
                              preferred_element_type=jnp.float32) + b1[...], 0.0)
    x = x + jnp.dot(hid.astype(_MM_DTYPE), w2[...],
                    preferred_element_type=jnp.float32) + b2[...]

    xbuf[...] = x                               # carry to the next layer (stays in VMEM)

    @pl.when(l == n_layers - 1)
    def _():
        o_ref[...] = _ln(x, fna[...], fnb[...], eps)   # final encoder norm folded in


def _decoder_stack_kernel(x_ref, mem_ref, tmask_ref, smask_ref,
                          ln1a, ln1b, wqkv_s, bqkv_s, wo_s, bo_s,
                          ln2a, ln2b, wq_c, bq_c, wkv_c, bkv_c, wo_c, bo_c,
                          ln3a, ln3b, w1, b1, w2, b2,
                          fna, fnb,
                          o_ref, xbuf,
                          *, B, T, S, h, eps):
    l = pl.program_id(0)
    n_layers = pl.num_programs(0)

    @pl.when(l == 0)
    def _():
        xbuf[...] = x_ref[...]

    x = xbuf[...]                               # (B*T, D)
    mem = mem_ref[...]                          # (B*S, D) encoder memory (loaded once)
    D = x.shape[-1]
    dk = D // h
    scale = 1.0 / math.sqrt(dk)

    # --- masked self-attention ---
    xn = _ln(x, ln1a[...], ln1b[...], eps)
    qkv = jnp.dot(xn.astype(_MM_DTYPE), wqkv_s[...],
                  preferred_element_type=jnp.float32) + bqkv_s[...]
    q, k, v = qkv[:, :D], qkv[:, D:2 * D], qkv[:, 2 * D:]
    attn = []
    for b in range(B):
        rt = slice(b * T, (b + 1) * T)
        neg = tmask_ref[b] == 0                           # (T, T) target mask
        attn.append(_mha(q[rt], k[rt], v[rt], neg, wo_s[...], h, dk, scale))
    x = x + jnp.concatenate(attn, axis=0) + bo_s[...]

    # --- cross-attention over encoder memory (K/V projections of memory, per reference) ---
    xn = _ln(x, ln2a[...], ln2b[...], eps)
    qc = jnp.dot(xn.astype(_MM_DTYPE), wq_c[...],
                 preferred_element_type=jnp.float32) + bq_c[...]
    kv = jnp.dot(mem.astype(_MM_DTYPE), wkv_c[...],
                 preferred_element_type=jnp.float32) + bkv_c[...]
    kc, vc = kv[:, :D], kv[:, D:]
    attn = []
    for b in range(B):
        rt = slice(b * T, (b + 1) * T)
        rsm = slice(b * S, (b + 1) * S)
        neg = jnp.broadcast_to(smask_ref[b] == 0, (T, S))
        attn.append(_mha(qc[rt], kc[rsm], vc[rsm], neg, wo_c[...], h, dk, scale))
    x = x + jnp.concatenate(attn, axis=0) + bo_c[...]

    # --- position-wise FFN ---
    xn = _ln(x, ln3a[...], ln3b[...], eps)
    hid = jnp.maximum(jnp.dot(xn.astype(_MM_DTYPE), w1[...],
                              preferred_element_type=jnp.float32) + b1[...], 0.0)
    x = x + jnp.dot(hid.astype(_MM_DTYPE), w2[...],
                    preferred_element_type=jnp.float32) + b2[...]

    xbuf[...] = x

    @pl.when(l == n_layers - 1)
    def _():
        o_ref[...] = _ln(x, fna[...], fnb[...], eps)   # final decoder norm folded in


# =========================== pallas_call wrappers ===========================

def _stk(shape):
    """Spec for a per-layer weight stacked on a leading layer axis (layer dim squeezed)."""
    n = len(shape)
    return pl.BlockSpec((None,) + tuple(shape[1:]),
                        lambda l, _n=n: (l,) + (0,) * (_n - 1))


def _cst(shape):
    """Spec for an input that is constant across the layer axis (DMA'd once)."""
    n = len(shape)
    return pl.BlockSpec(tuple(shape), lambda l, _n=n: (0,) * _n)


def encoder_stack(x2d, smask, enc, *, B, S, D, dff, h, n_layers, eps=1e-6):
    return pl.pallas_call(
        functools.partial(_encoder_stack_kernel, B=B, S=S, h=h, eps=eps),
        out_shape=jax.ShapeDtypeStruct((B * S, D), jnp.float32),
        grid=(n_layers,),
        in_specs=[
            _cst((B * S, D)),                               # activations (loaded once)
            _cst((B, 1, S)),                                # int source mask (loaded once)
            _stk((n_layers, 1, D)), _stk((n_layers, 1, D)),         # ln1
            _stk((n_layers, D, 3 * D)), _stk((n_layers, 1, 3 * D)), # fused QKV
            _stk((n_layers, D, D)), _stk((n_layers, 1, D)),         # out proj
            _stk((n_layers, 1, D)), _stk((n_layers, 1, D)),         # ln2
            _stk((n_layers, D, dff)), _stk((n_layers, 1, dff)),     # ffn w1/b1
            _stk((n_layers, dff, D)), _stk((n_layers, 1, D)),       # ffn w2/b2
            _cst((1, D)), _cst((1, D)),                             # final norm
        ],
        out_specs=_cst((B * S, D)),
        scratch_shapes=[pltpu.VMEM((B * S, D), jnp.float32)],       # layer-to-layer carry
        compiler_params=pltpu.CompilerParams(
            dimension_semantics=("arbitrary",)),            # layer axis is a carried dep
    )(x2d, smask,
      enc["ln1a"], enc["ln1b"], enc["wqkv"], enc["bqkv"], enc["wo"], enc["bo"],
      enc["ln2a"], enc["ln2b"], enc["w1"], enc["b1"], enc["w2"], enc["b2"],
      enc["norm_a"], enc["norm_b"])


def decoder_stack(x2d, mem2d, tmask, smask, dec, *, B, T, S, D, dff, h, n_layers, eps=1e-6):
    return pl.pallas_call(
        functools.partial(_decoder_stack_kernel, B=B, T=T, S=S, h=h, eps=eps),
        out_shape=jax.ShapeDtypeStruct((B * T, D), jnp.float32),
        grid=(n_layers,),
        in_specs=[
            _cst((B * T, D)),                               # target activations
            _cst((B * S, D)),                               # encoder memory
            _cst((B, T, T)),                                # target mask (int)
            _cst((B, 1, S)),                                # source mask (int)
            _stk((n_layers, 1, D)), _stk((n_layers, 1, D)),          # ln1
            _stk((n_layers, D, 3 * D)), _stk((n_layers, 1, 3 * D)),  # fused QKV (self)
            _stk((n_layers, D, D)), _stk((n_layers, 1, D)),          # wo/bo (self)
            _stk((n_layers, 1, D)), _stk((n_layers, 1, D)),          # ln2
            _stk((n_layers, D, D)), _stk((n_layers, 1, D)),          # wq/bq (cross)
            _stk((n_layers, D, 2 * D)), _stk((n_layers, 1, 2 * D)),  # fused KV (cross)
            _stk((n_layers, D, D)), _stk((n_layers, 1, D)),          # wo/bo (cross)
            _stk((n_layers, 1, D)), _stk((n_layers, 1, D)),          # ln3
            _stk((n_layers, D, dff)), _stk((n_layers, 1, dff)),      # ffn w1/b1
            _stk((n_layers, dff, D)), _stk((n_layers, 1, D)),        # ffn w2/b2
            _cst((1, D)), _cst((1, D)),                              # final norm
        ],
        out_specs=_cst((B * T, D)),
        scratch_shapes=[pltpu.VMEM((B * T, D), jnp.float32)],
        compiler_params=pltpu.CompilerParams(
            dimension_semantics=("arbitrary",)),
    )(x2d, mem2d, tmask, smask,
      dec["ln1a"], dec["ln1b"], dec["wqkv_s"], dec["bqkv_s"], dec["wo_s"], dec["bo_s"],
      dec["ln2a"], dec["ln2b"], dec["wq_c"], dec["bq_c"], dec["wkv_c"], dec["bkv_c"],
      dec["wo_c"], dec["bo_c"],
      dec["ln3a"], dec["ln3b"], dec["w1"], dec["b1"], dec["w2"], dec["b2"],
      dec["norm_a"], dec["norm_b"])


# =========================== model glue (embeddings in XLA, stacks in Pallas) ===========================

def embed(lut, pe, tokens, d_model):
    # TODO(synk): embedding-table gather stays in XLA (jnp.take); no dense Pallas win at this size.
    x = jnp.take(lut, tokens, axis=0) * math.sqrt(d_model)
    return x + pe[None, : tokens.shape[1], :]   # dropout is identity (eval mode)


def encode(params, source, source_mask):
    D, h, dff, n = params["d_model"], params["h"], params["d_ff"], params["n_layers"]
    x = embed(params["src_lut"], params["pe"], source, D)
    B, S, _ = x.shape
    y = encoder_stack(x.reshape(B * S, D), source_mask.astype(jnp.int32),
                      params["encoder"], B=B, S=S, D=D, dff=dff, h=h, n_layers=n)
    return y.reshape(B, S, D)


def decode(params, memory, source_mask, target, target_mask):
    D, h, dff, n = params["d_model"], params["h"], params["d_ff"], params["n_layers"]
    x = embed(params["tgt_lut"], params["pe"], target, D)
    B, T, _ = x.shape
    S = memory.shape[1]
    y = decoder_stack(x.reshape(B * T, D), memory.reshape(B * S, D),
                      target_mask.astype(jnp.int32), source_mask.astype(jnp.int32),
                      params["decoder"], B=B, T=T, S=S, D=D, dff=dff, h=h, n_layers=n)
    return y.reshape(B, T, D)


def encoder_decoder_forward(params, source, target, source_mask, target_mask):
    """Exactly EncoderDecoder.forward: decode(encode(src, src_mask), src_mask, tgt, tgt_mask)."""
    return decode(params, encode(params, source, source_mask),
                  source_mask, target, target_mask)


# =========================== deterministic parameter init (layer-stacked) ===========================

def sinusoidal_pe(max_len, d_model):
    pos = jnp.arange(max_len, dtype=jnp.float32)[:, None]
    div = jnp.exp(jnp.arange(0, d_model, 2, dtype=jnp.float32)
                  * (-math.log(10000.0) / d_model))
    pe = jnp.zeros((max_len, d_model), jnp.float32)
    pe = pe.at[:, 0::2].set(jnp.sin(pos * div))
    pe = pe.at[:, 1::2].set(jnp.cos(pos * div))
    return pe


def init_params(key, vocab, d_model=128, d_ff=256, h=4, n_layers=2, max_len=64):
    keys = iter(jax.random.split(key, 64))
    n, D, F = n_layers, d_model, d_ff

    def w(shape):   # matmul weights in bf16 (MXU inputs); per-layer stacked on axis 0
        return (jax.random.normal(next(keys), shape, jnp.float32) * 0.02).astype(_MM_DTYPE)

    def zeros(shape): return jnp.zeros(shape, jnp.float32)
    def ones(shape): return jnp.ones(shape, jnp.float32)

    enc = {
        "ln1a": ones((n, 1, D)), "ln1b": zeros((n, 1, D)),
        "wqkv": w((n, D, 3 * D)), "bqkv": zeros((n, 1, 3 * D)),
        "wo": w((n, D, D)), "bo": zeros((n, 1, D)),
        "ln2a": ones((n, 1, D)), "ln2b": zeros((n, 1, D)),
        "w1": w((n, D, F)), "b1": zeros((n, 1, F)),
        "w2": w((n, F, D)), "b2": zeros((n, 1, D)),
        "norm_a": ones((1, D)), "norm_b": zeros((1, D)),
    }
    dec = {
        "ln1a": ones((n, 1, D)), "ln1b": zeros((n, 1, D)),
        "wqkv_s": w((n, D, 3 * D)), "bqkv_s": zeros((n, 1, 3 * D)),
        "wo_s": w((n, D, D)), "bo_s": zeros((n, 1, D)),
        "ln2a": ones((n, 1, D)), "ln2b": zeros((n, 1, D)),
        "wq_c": w((n, D, D)), "bq_c": zeros((n, 1, D)),
        "wkv_c": w((n, D, 2 * D)), "bkv_c": zeros((n, 1, 2 * D)),
        "wo_c": w((n, D, D)), "bo_c": zeros((n, 1, D)),
        "ln3a": ones((n, 1, D)), "ln3b": zeros((n, 1, D)),
        "w1": w((n, D, F)), "b1": zeros((n, 1, F)),
        "w2": w((n, F, D)), "b2": zeros((n, 1, D)),
        "norm_a": ones((1, D)), "norm_b": zeros((1, D)),
    }
    return {
        "d_model": D, "h": h, "d_ff": F, "n_layers": n,
        "src_lut": jax.random.normal(next(keys), (vocab, D), jnp.float32) * 0.02,
        "tgt_lut": jax.random.normal(next(keys), (vocab, D), jnp.float32) * 0.02,
        "pe": sinusoidal_pe(max_len, D),
        "encoder": enc, "decoder": dec,
        # generator head exists on the PyTorch module but is never applied in forward()
        "generator": {"w": w((D, vocab)), "b": zeros((1, vocab))},
    }


if __name__ == "__main__":
    B, S, T = 2, 8, 8
    vocab = 50
    # d_model/d_ff chosen lane-dense (multiples of 128) per the perf review; h=4 -> dk=32.
    d_model, d_ff, h, n_layers = 128, 256, 4, 2

    key = jax.random.PRNGKey(0)
    kp, ks, kt = jax.random.split(key, 3)
    params = init_params(kp, vocab, d_model, d_ff, h, n_layers)

    source = jax.random.randint(ks, (B, S), 1, vocab, dtype=jnp.int32)
    target = jax.random.randint(kt, (B, T), 1, vocab, dtype=jnp.int32)
    source_mask = jnp.ones((B, 1, S), dtype=jnp.int32)                       # (src != pad).unsqueeze(-2)
    target_mask = jnp.broadcast_to(jnp.tril(jnp.ones((T, T), jnp.int32))[None], (B, T, T))

    out = encoder_decoder_forward(params, source, target, source_mask, target_mask)
    out = jax.block_until_ready(out)

    assert out.shape == (B, T, d_model), out.shape
    assert bool(jnp.all(jnp.isfinite(out)))
    print("KERNEL_OK")
</pallas_src>

<mosaic_0001>
module attributes {stable_mosaic.version = 11 : i64} {
  func.func @_encoder_stack_kernel(%arg0: i32, %arg1: memref<16x128xf32, #tpu.memory_space<vmem>>, %arg2: memref<2x1x8xi32, #tpu.memory_space<vmem>>, %arg3: memref<1x1x128xf32, #tpu.memory_space<vmem>>, %arg4: memref<1x1x128xf32, #tpu.memory_space<vmem>>, %arg5: memref<1x128x384xbf16, #tpu.memory_space<vmem>>, %arg6: memref<1x1x384xf32, #tpu.memory_space<vmem>>, %arg7: memref<1x128x128xbf16, #tpu.memory_space<vmem>>, %arg8: memref<1x1x128xf32, #tpu.memory_space<vmem>>, %arg9: memref<1x1x128xf32, #tpu.memory_space<vmem>>, %arg10: memref<1x1x128xf32, #tpu.memory_space<vmem>>, %arg11: memref<1x128x256xbf16, #tpu.memory_space<vmem>>, %arg12: memref<1x1x256xf32, #tpu.memory_space<vmem>>, %arg13: memref<1x256x128xbf16, #tpu.memory_space<vmem>>, %arg14: memref<1x1x128xf32, #tpu.memory_space<vmem>>, %arg15: memref<1x128xf32, #tpu.memory_space<vmem>>, %arg16: memref<1x128xf32, #tpu.memory_space<vmem>>, %arg17: memref<16x128xf32, #tpu.memory_space<vmem>>, %arg18: memref<16x128xf32, #tpu.memory_space<vmem>>) attributes {dimension_semantics = [#tpu.dimension_semantics<arbitrary>], iteration_bounds = array<i64: 2>, scalar_prefetch = 0 : i64, scratch_operands = 1 : i64, tpu.core_type = #tpu.core_type<tc>, window_params = [{pipeline_mode = #tpu.pipeline_mode<synchronous>, transform_indices = @transform_0, window_bounds = array<i64: 16, 128>}, {pipeline_mode = #tpu.pipeline_mode<synchronous>, transform_indices = @transform_1, window_bounds = array<i64: 2, 1, 8>}, {transform_indices = @transform_2, window_bounds = array<i64: 1, 1, 128>}, {transform_indices = @transform_3, window_bounds = array<i64: 1, 1, 128>}, {transform_indices = @transform_4, window_bounds = array<i64: 1, 128, 384>}, {transform_indices = @transform_5, window_bounds = array<i64: 1, 1, 384>}, {transform_indices = @transform_6, window_bounds = array<i64: 1, 128, 128>}, {transform_indices = @transform_7, window_bounds = array<i64: 1, 1, 128>}, {transform_indices = @transform_8, window_bounds = array<i64: 1, 1, 128>}, {transform_indices = @transform_9, window_bounds = array<i64: 1, 1, 128>}, {transform_indices = @transform_10, window_bounds = array<i64: 1, 128, 256>}, {transform_indices = @transform_11, window_bounds = array<i64: 1, 1, 256>}, {transform_indices = @transform_12, window_bounds = array<i64: 1, 256, 128>}, {transform_indices = @transform_13, window_bounds = array<i64: 1, 1, 128>}, {pipeline_mode = #tpu.pipeline_mode<synchronous>, transform_indices = @transform_14, window_bounds = array<i64: 1, 128>}, {pipeline_mode = #tpu.pipeline_mode<synchronous>, transform_indices = @transform_15, window_bounds = array<i64: 1, 128>}, {pipeline_mode = #tpu.pipeline_mode<synchronous>, transform_indices = @transform_16, window_bounds = array<i64: 16, 128>}]} {
    %c0_i32 = arith.constant 0 : i32
    %0 = arith.cmpi eq, %arg0, %c0_i32 : i32
    %1 = arith.extui %0 : i1 to i32
    %c0_i32_0 = arith.constant 0 : i32
    %2 = arith.cmpi ne, %1, %c0_i32_0 : i32
    scf.if %2 {
      %c0_114 = arith.constant 0 : index
      %c0_115 = arith.constant 0 : index
      %306 = vector.load %arg1[%c0_114, %c0_115] : memref<16x128xf32, #tpu.memory_space<vmem>>, vector<16x128xf32>
      %c0_116 = arith.constant 0 : index
      %c0_117 = arith.constant 0 : index
      %307 = vector.load %arg18[%c0_116, %c0_117] : memref<16x128xf32, #tpu.memory_space<vmem>>, vector<16x128xf32>
      tpu.vector_store %arg18[%c0_116, %c0_117], %306 {strides = array<i32>} : memref<16x128xf32, #tpu.memory_space<vmem>>, vector<16x128xf32>,
    } else {
    }
    %c0 = arith.constant 0 : index
    %c0_1 = arith.constant 0 : index
    %3 = vector.load %arg18[%c0, %c0_1] : memref<16x128xf32, #tpu.memory_space<vmem>>, vector<16x128xf32>
    %c0_2 = arith.constant 0 : index
    %c0_3 = arith.constant 0 : index
    %c0_4 = arith.constant 0 : index
    %4 = vector.load %arg3[%c0_2, %c0_3, %c0_4] : memref<1x1x128xf32, #tpu.memory_space<vmem>>, vector<1x1x128xf32>
    %5 = vector.shape_cast %4 : vector<1x1x128xf32> to vector<1x128xf32>
    %c0_5 = arith.constant 0 : index
    %c0_6 = arith.constant 0 : index
    %c0_7 = arith.constant 0 : index
    %6 = vector.load %arg4[%c0_5, %c0_6, %c0_7] : memref<1x1x128xf32, #tpu.memory_space<vmem>>, vector<1x1x128xf32>
    %7 = vector.shape_cast %6 : vector<1x1x128xf32> to vector<1x128xf32>
    %cst = arith.constant dense<0.000000e+00> : vector<16xf32>
    %8 = vector.multi_reduction <add>, %3, %cst [1] : vector<16x128xf32> to vector<16xf32>
    %9 = vector.shape_cast %8 : vector<16xf32> to vector<16x1xf32>
    %cst_8 = arith.constant 1.280000e+02 : f32
    %10 = vector.broadcast %cst_8 : f32 to vector<16x1xf32>
    %11 = arith.divf %9, %10 : vector<16x1xf32>
    %12 = vector.broadcast %11 : vector<16x1xf32> to vector<16x128xf32>
    %13 = arith.subf %3, %12 : vector<16x128xf32>
    %14 = arith.mulf %13, %13 : vector<16x128xf32>
    %cst_9 = arith.constant dense<0.000000e+00> : vector<16xf32>
    %15 = vector.multi_reduction <add>, %14, %cst_9 [1] : vector<16x128xf32> to vector<16xf32>
    %16 = vector.shape_cast %15 : vector<16xf32> to vector<16x1xf32>
    %cst_10 = arith.constant 1.270000e+02 : f32
    %17 = vector.broadcast %cst_10 : f32 to vector<16x1xf32>
    %18 = arith.divf %16, %17 : vector<16x1xf32>
    %19 = math.sqrt %18 : vector<16x1xf32>
    %20 = vector.broadcast %5 : vector<1x128xf32> to vector<16x128xf32>
    %21 = arith.mulf %20, %13 : vector<16x128xf32>
    %cst_11 = arith.constant 9.99999997E-7 : f32
    %22 = vector.broadcast %cst_11 : f32 to vector<16x1xf32>
    %23 = arith.addf %19, %22 : vector<16x1xf32>
    %24 = vector.broadcast %23 : vector<16x1xf32> to vector<16x128xf32>
    %25 = arith.divf %21, %24 : vector<16x128xf32>
    %26 = vector.broadcast %7 : vector<1x128xf32> to vector<16x128xf32>
    %27 = arith.addf %25, %26 : vector<16x128xf32>
    %28 = arith.truncf %27 : vector<16x128xf32> to vector<16x128xbf16>
    %c0_12 = arith.constant 0 : index
    %c0_13 = arith.constant 0 : index
    %c0_14 = arith.constant 0 : index
    %29 = vector.load %arg5[%c0_12, %c0_13, %c0_14] : memref<1x128x384xbf16, #tpu.memory_space<vmem>>, vector<1x128x384xbf16>
    %30 = vector.shape_cast %29 : vector<1x128x384xbf16> to vector<128x384xbf16>
    %cst_15 = arith.constant dense<0.000000e+00> : vector<16x384xf32>
    %31 = tpu.matmul %28, %30, %cst_15 {dimension_numbers = #tpu.dot_dimension_numbers<[1], [0], [0], [1], [0, 0, 1, 1], [], []>} : vector<16x128xbf16>, vector<128x384xbf16>, vector<16x384xf32> -> vector<16x384xf32>
    %c0_16 = arith.constant 0 : index
    %c0_17 = arith.constant 0 : index
    %c0_18 = arith.constant 0 : index
    %32 = vector.load %arg6[%c0_16, %c0_17, %c0_18] : memref<1x1x384xf32, #tpu.memory_space<vmem>>, vector<1x1x384xf32>
    %33 = vector.shape_cast %32 : vector<1x1x384xf32> to vector<1x384xf32>
    %34 = vector.broadcast %33 : vector<1x384xf32> to vector<16x384xf32>
    %35 = arith.addf %31, %34 : vector<16x384xf32>
    %36 = vector.extract_strided_slice %35 {offsets = [0, 0], sizes = [16, 128], strides = [1, 1]} : vector<16x384xf32> to vector<16x128xf32>
    %37 = vector.extract_strided_slice %35 {offsets = [0, 128], sizes = [16, 128], strides = [1, 1]} : vector<16x384xf32> to vector<16x128xf32>
    %38 = vector.extract_strided_slice %35 {offsets = [0, 256], sizes = [16, 128], strides = [1, 1]} : vector<16x384xf32> to vector<16x128xf32>
    %c0_19 = arith.constant 0 : index
    %c0_20 = arith.constant 0 : index
    %c0_21 = arith.constant 0 : index
    %39 = vector.load %arg2[%c0_19, %c0_20, %c0_21] : memref<2x1x8xi32, #tpu.memory_space<vmem>>, vector<1x1x8xi32>
    %40 = vector.shape_cast %39 : vector<1x1x8xi32> to vector<1x8xi32>
    %c0_i32_22 = arith.constant 0 : i32
    %41 = vector.broadcast %c0_i32_22 : i32 to vector<1x8xi32>
    %42 = arith.cmpi eq, %40, %41 : vector<1x8xi32>
    %43 = vector.shape_cast %42 : vector<1x8xi1> to vector<1x8xi1>
    %44 = vector.broadcast %43 : vector<1x8xi1> to vector<8x8xi1>
    %45 = vector.extract_strided_slice %36 {offsets = [0, 0], sizes = [8, 128], strides = [1, 1]} : vector<16x128xf32> to vector<8x128xf32>
    %46 = vector.extract_strided_slice %37 {offsets = [0, 0], sizes = [8, 128], strides = [1, 1]} : vector<16x128xf32> to vector<8x128xf32>
    %47 = vector.extract_strided_slice %38 {offsets = [0, 0], sizes = [8, 128], strides = [1, 1]} : vector<16x128xf32> to vector<8x128xf32>
    %c0_23 = arith.constant 0 : index
    %c0_24 = arith.constant 0 : index
    %c0_25 = arith.constant 0 : index
    %48 = vector.load %arg7[%c0_23, %c0_24, %c0_25] : memref<1x128x128xbf16, #tpu.memory_space<vmem>>, vector<1x128x128xbf16>
    %49 = vector.shape_cast %48 : vector<1x128x128xbf16> to vector<128x128xbf16>
    %50 = tpu.transpose %46, [1, 0] : vector<8x128xf32> -> vector<128x8xf32>
    %51 = vector.extract_strided_slice %45 {offsets = [0, 0], sizes = [8, 32], strides = [1, 1]} : vector<8x128xf32> to vector<8x32xf32>
    %52 = arith.truncf %51 : vector<8x32xf32> to vector<8x32xbf16>
    %53 = vector.extract_strided_slice %50 {offsets = [0, 0], sizes = [32, 8], strides = [1, 1]} : vector<128x8xf32> to vector<32x8xf32>
    %54 = arith.truncf %53 : vector<32x8xf32> to vector<32x8xbf16>
    %cst_26 = arith.constant dense<0.000000e+00> : vector<8x8xf32>
    %55 = tpu.matmul %52, %54, %cst_26 {dimension_numbers = #tpu.dot_dimension_numbers<[1], [0], [0], [1], [0, 0, 1, 1], [], []>} : vector<8x32xbf16>, vector<32x8xbf16>, vector<8x8xf32> -> vector<8x8xf32>
    %cst_27 = arith.constant 0.176776692 : f32
    %56 = vector.broadcast %cst_27 : f32 to vector<8x8xf32>
    %57 = arith.mulf %55, %56 : vector<8x8xf32>
    %cst_28 = arith.constant -1.000000e+09 : f32
    %58 = vector.broadcast %cst_28 : f32 to vector<8x8xf32>
    %59 = arith.select %44, %58, %57 : vector<8x8xi1>, vector<8x8xf32>
    %cst_29 = arith.constant dense<0xFF800000> : vector<8xf32>
    %60 = vector.multi_reduction <maximumf>, %59, %cst_29 [1] : vector<8x8xf32> to vector<8xf32>
    %61 = vector.shape_cast %60 : vector<8xf32> to vector<8x1xf32>
    %62 = vector.broadcast %61 : vector<8x1xf32> to vector<8x8xf32>
    %63 = arith.subf %59, %62 : vector<8x8xf32>
    %64 = math.exp %63 : vector<8x8xf32>
    %cst_30 = arith.constant dense<0.000000e+00> : vector<8xf32>
    %65 = vector.multi_reduction <add>, %64, %cst_30 [1] : vector<8x8xf32> to vector<8xf32>
    %66 = vector.shape_cast %65 : vector<8xf32> to vector<8x1xf32>
    %67 = tpu.reciprocal %66 {approx = true} : vector<8x1xf32> -> vector<8x1xf32>
    %68 = vector.broadcast %67 : vector<8x1xf32> to vector<8x8xf32>
    %69 = arith.mulf %64, %68 : vector<8x8xf32>
    %70 = arith.truncf %69 : vector<8x8xf32> to vector<8x8xbf16>
    %71 = vector.extract_strided_slice %47 {offsets = [0, 0], sizes = [8, 32], strides = [1, 1]} : vector<8x128xf32> to vector<8x32xf32>
    %72 = arith.truncf %71 : vector<8x32xf32> to vector<8x32xbf16>
    %cst_31 = arith.constant dense<0.000000e+00> : vector<8x32xf32>
    %73 = tpu.matmul %70, %72, %cst_31 {dimension_numbers = #tpu.dot_dimension_numbers<[1], [0], [0], [1], [0, 0, 1, 1], [], []>} : vector<8x8xbf16>, vector<8x32xbf16>, vector<8x32xf32> -> vector<8x32xf32>
    %74 = vector.extract_strided_slice %45 {offsets = [0, 32], sizes = [8, 32], strides = [1, 1]} : vector<8x128xf32> to vector<8x32xf32>
    %75 = arith.truncf %74 : vector<8x32xf32> to vector<8x32xbf16>
    %76 = vector.extract_strided_slice %50 {offsets = [32, 0], sizes = [32, 8], strides = [1, 1]} : vector<128x8xf32> to vector<32x8xf32>
    %77 = arith.truncf %76 : vector<32x8xf32> to vector<32x8xbf16>
    %cst_32 = arith.constant dense<0.000000e+00> : vector<8x8xf32>
    %78 = tpu.matmul %75, %77, %cst_32 {dimension_numbers = #tpu.dot_dimension_numbers<[1], [0], [0], [1], [0, 0, 1, 1], [], []>} : vector<8x32xbf16>, vector<32x8xbf16>, vector<8x8xf32> -> vector<8x8xf32>
    %cst_33 = arith.constant 0.176776692 : f32
    %79 = vector.broadcast %cst_33 : f32 to vector<8x8xf32>
    %80 = arith.mulf %78, %79 : vector<8x8xf32>
    %cst_34 = arith.constant -1.000000e+09 : f32
    %81 = vector.broadcast %cst_34 : f32 to vector<8x8xf32>
    %82 = arith.select %44, %81, %80 : vector<8x8xi1>, vector<8x8xf32>
    %cst_35 = arith.constant dense<0xFF800000> : vector<8xf32>
    %83 = vector.multi_reduction <maximumf>, %82, %cst_35 [1] : vector<8x8xf32> to vector<8xf32>
    %84 = vector.shape_cast %83 : vector<8xf32> to vector<8x1xf32>
    %85 = vector.broadcast %84 : vector<8x1xf32> to vector<8x8xf32>
    %86 = arith.subf %82, %85 : vector<8x8xf32>
    %87 = math.exp %86 : vector<8x8xf32>
    %cst_36 = arith.constant dense<0.000000e+00> : vector<8xf32>
    %88 = vector.multi_reduction <add>, %87, %cst_36 [1] : vector<8x8xf32> to vector<8xf32>
    %89 = vector.shape_cast %88 : vector<8xf32> to vector<8x1xf32>
    %90 = tpu.reciprocal %89 {approx = true} : vector<8x1xf32> -> vector<8x1xf32>
    %91 = vector.broadcast %90 : vector<8x1xf32> to vector<8x8xf32>
    %92 = arith.mulf %87, %91 : vector<8x8xf32>
    %93 = arith.truncf %92 : vector<8x8xf32> to vector<8x8xbf16>
    %94 = vector.extract_strided_slice %47 {offsets = [0, 32], sizes = [8, 32], strides = [1, 1]} : vector<8x128xf32> to vector<8x32xf32>
    %95 = arith.truncf %94 : vector<8x32xf32> to vector<8x32xbf16>
    %cst_37 = arith.constant dense<0.000000e+00> : vector<8x32xf32>
    %96 = tpu.matmul %93, %95, %cst_37 {dimension_numbers = #tpu.dot_dimension_numbers<[1], [0], [0], [1], [0, 0, 1, 1], [], []>} : vector<8x8xbf16>, vector<8x32xbf16>, vector<8x32xf32> -> vector<8x32xf32>
    %97 = vector.extract_strided_slice %45 {offsets = [0, 64], sizes = [8, 32], strides = [1, 1]} : vector<8x128xf32> to vector<8x32xf32>
    %98 = arith.truncf %97 : vector<8x32xf32> to vector<8x32xbf16>
    %99 = vector.extract_strided_slice %50 {offsets = [64, 0], sizes = [32, 8], strides = [1, 1]} : vector<128x8xf32> to vector<32x8xf32>
    %100 = arith.truncf %99 : vector<32x8xf32> to vector<32x8xbf16>
    %cst_38 = arith.constant dense<0.000000e+00> : vector<8x8xf32>
    %101 = tpu.matmul %98, %100, %cst_38 {dimension_numbers = #tpu.dot_dimension_numbers<[1], [0], [0], [1], [0, 0, 1, 1], [], []>} : vector<8x32xbf16>, vector<32x8xbf16>, vector<8x8xf32> -> vector<8x8xf32>
    %cst_39 = arith.constant 0.176776692 : f32
    %102 = vector.broadcast %cst_39 : f32 to vector<8x8xf32>
    %103 = arith.mulf %101, %102 : vector<8x8xf32>
    %cst_40 = arith.constant -1.000000e+09 : f32
    %104 = vector.broadcast %cst_40 : f32 to vector<8x8xf32>
    %105 = arith.select %44, %104, %103 : vector<8x8xi1>, vector<8x8xf32>
    %cst_41 = arith.constant dense<0xFF800000> : vector<8xf32>
    %106 = vector.multi_reduction <maximumf>, %105, %cst_41 [1] : vector<8x8xf32> to vector<8xf32>
    %107 = vector.shape_cast %106 : vector<8xf32> to vector<8x1xf32>
    %108 = vector.broadcast %107 : vector<8x1xf32> to vector<8x8xf32>
    %109 = arith.subf %105, %108 : vector<8x8xf32>
    %110 = math.exp %109 : vector<8x8xf32>
    %cst_42 = arith.constant dense<0.000000e+00> : vector<8xf32>
    %111 = vector.multi_reduction <add>, %110, %cst_42 [1] : vector<8x8xf32> to vector<8xf32>
    %112 = vector.shape_cast %111 : vector<8xf32> to vector<8x1xf32>
    %113 = tpu.reciprocal %112 {approx = true} : vector<8x1xf32> -> vector<8x1xf32>
    %114 = vector.broadcast %113 : vector<8x1xf32> to vector<8x8xf32>
    %115 = arith.mulf %110, %114 : vector<8x8xf32>
    %116 = arith.truncf %115 : vector<8x8xf32> to vector<8x8xbf16>
    %117 = vector.extract_strided_slice %47 {offsets = [0, 64], sizes = [8, 32], strides = [1, 1]} : vector<8x128xf32> to vector<8x32xf32>
    %118 = arith.truncf %117 : vector<8x32xf32> to vector<8x32xbf16>
    %cst_43 = arith.constant dense<0.000000e+00> : vector<8x32xf32>
    %119 = tpu.matmul %116, %118, %cst_43 {dimension_numbers = #tpu.dot_dimension_numbers<[1], [0], [0], [1], [0, 0, 1, 1], [], []>} : vector<8x8xbf16>, vector<8x32xbf16>, vector<8x32xf32> -> vector<8x32xf32>
    %120 = vector.extract_strided_slice %45 {offsets = [0, 96], sizes = [8, 32], strides = [1, 1]} : vector<8x128xf32> to vector<8x32xf32>
    %121 = arith.truncf %120 : vector<8x32xf32> to vector<8x32xbf16>
    %122 = vector.extract_strided_slice %50 {offsets = [96, 0], sizes = [32, 8], strides = [1, 1]} : vector<128x8xf32> to vector<32x8xf32>
    %123 = arith.truncf %122 : vector<32x8xf32> to vector<32x8xbf16>
    %cst_44 = arith.constant dense<0.000000e+00> : vector<8x8xf32>
    %124 = tpu.matmul %121, %123, %cst_44 {dimension_numbers = #tpu.dot_dimension_numbers<[1], [0], [0], [1], [0, 0, 1, 1], [], []>} : vector<8x32xbf16>, vector<32x8xbf16>, vector<8x8xf32> -> vector<8x8xf32>
    %cst_45 = arith.constant 0.176776692 : f32
    %125 = vector.broadcast %cst_45 : f32 to vector<8x8xf32>
    %126 = arith.mulf %124, %125 : vector<8x8xf32>
    %cst_46 = arith.constant -1.000000e+09 : f32
    %127 = vector.broadcast %cst_46 : f32 to vector<8x8xf32>
    %128 = arith.select %44, %127, %126 : vector<8x8xi1>, vector<8x8xf32>
    %cst_47 = arith.constant dense<0xFF800000> : vector<8xf32>
    %129 = vector.multi_reduction <maximumf>, %128, %cst_47 [1] : vector<8x8xf32> to vector<8xf32>
    %130 = vector.shape_cast %129 : vector<8xf32> to vector<8x1xf32>
    %131 = vector.broadcast %130 : vector<8x1xf32> to vector<8x8xf32>
    %132 = arith.subf %128, %131 : vector<8x8xf32>
    %133 = math.exp %132 : vector<8x8xf32>
    %cst_48 = arith.constant dense<0.000000e+00> : vector<8xf32>
    %134 = vector.multi_reduction <add>, %133, %cst_48 [1] : vector<8x8xf32> to vector<8xf32>
    %135 = vector.shape_cast %134 : vector<8xf32> to vector<8x1xf32>
    %136 = tpu.reciprocal %135 {approx = true} : vector<8x1xf32> -> vector<8x1xf32>
    %137 = vector.broadcast %136 : vector<8x1xf32> to vector<8x8xf32>
    %138 = arith.mulf %133, %137 : vector<8x8xf32>
    %139 = arith.truncf %138 : vector<8x8xf32> to vector<8x8xbf16>
    %140 = vector.extract_strided_slice %47 {offsets = [0, 96], sizes = [8, 32], strides = [1, 1]} : vector<8x128xf32> to vector<8x32xf32>
    %141 = arith.truncf %140 : vector<8x32xf32> to vector<8x32xbf16>
    %cst_49 = arith.constant dense<0.000000e+00> : vector<8x32xf32>
    %142 = tpu.matmul %139, %141, %cst_49 {dimension_numbers = #tpu.dot_dimension_numbers<[1], [0], [0], [1], [0, 0, 1, 1], [], []>} : vector<8x8xbf16>, vector<8x32xbf16>, vector<8x32xf32> -> vector<8x32xf32>
    %143 = tpu.concatenate %73, %96, %119, %142 in 1 : vector<8x32xf32>, vector<8x32xf32>, vector<8x32xf32>, vector<8x32xf32> -> vector<8x128xf32>
    %144 = arith.truncf %143 : vector<8x128xf32> to vector<8x128xbf16>
    %cst_50 = arith.constant dense<0.000000e+00> : vector<8x128xf32>
    %145 = tpu.matmul %144, %49, %cst_50 {dimension_numbers = #tpu.dot_dimension_numbers<[1], [0], [0], [1], [0, 0, 1, 1], [], []>} : vector<8x128xbf16>, vector<128x128xbf16>, vector<8x128xf32> -> vector<8x128xf32>
    %c1 = arith.constant 1 : index
    %c0_51 = arith.constant 0 : index
    %c0_52 = arith.constant 0 : index
    %146 = vector.load %arg2[%c1, %c0_51, %c0_52] : memref<2x1x8xi32, #tpu.memory_space<vmem>>, vector<1x1x8xi32>
    %147 = vector.shape_cast %146 : vector<1x1x8xi32> to vector<1x8xi32>
    %c0_i32_53 = arith.constant 0 : i32
    %148 = vector.broadcast %c0_i32_53 : i32 to vector<1x8xi32>
    %149 = arith.cmpi eq, %147, %148 : vector<1x8xi32>
    %150 = vector.shape_cast %149 : vector<1x8xi1> to vector<1x8xi1>
    %151 = vector.broadcast %150 : vector<1x8xi1> to vector<8x8xi1>
    %152 = vector.extract_strided_slice %36 {offsets = [8, 0], sizes = [8, 128], strides = [1, 1]} : vector<16x128xf32> to vector<8x128xf32>
    %153 = vector.extract_strided_slice %37 {offsets = [8, 0], sizes = [8, 128], strides = [1, 1]} : vector<16x128xf32> to vector<8x128xf32>
    %154 = vector.extract_strided_slice %38 {offsets = [8, 0], sizes = [8, 128], strides = [1, 1]} : vector<16x128xf32> to vector<8x128xf32>
    %c0_54 = arith.constant 0 : index
    %c0_55 = arith.constant 0 : index
    %c0_56 = arith.constant 0 : index
    %155 = vector.load %arg7[%c0_54, %c0_55, %c0_56] : memref<1x128x128xbf16, #tpu.memory_space<vmem>>, vector<1x128x128xbf16>
    %156 = vector.shape_cast %155 : vector<1x128x128xbf16> to vector<128x128xbf16>
    %157 = tpu.transpose %153, [1, 0] : vector<8x128xf32> -> vector<128x8xf32>
    %158 = vector.extract_strided_slice %152 {offsets = [0, 0], sizes = [8, 32], strides = [1, 1]} : vector<8x128xf32> to vector<8x32xf32>
    %159 = arith.truncf %158 : vector<8x32xf32> to vector<8x32xbf16>
    %160 = vector.extract_strided_slice %157 {offsets = [0, 0], sizes = [32, 8], strides = [1, 1]} : vector<128x8xf32> to vector<32x8xf32>
    %161 = arith.truncf %160 : vector<32x8xf32> to vector<32x8xbf16>
    %cst_57 = arith.constant dense<0.000000e+00> : vector<8x8xf32>
    %162 = tpu.matmul %159, %161, %cst_57 {dimension_numbers = #tpu.dot_dimension_numbers<[1], [0], [0], [1], [0, 0, 1, 1], [], []>} : vector<8x32xbf16>, vector<32x8xbf16>, vector<8x8xf32> -> vector<8x8xf32>
    %cst_58 = arith.constant 0.176776692 : f32
    %163 = vector.broadcast %cst_58 : f32 to vector<8x8xf32>
    %164 = arith.mulf %162, %163 : vector<8x8xf32>
    %cst_59 = arith.constant -1.000000e+09 : f32
    %165 = vector.broadcast %cst_59 : f32 to vector<8x8xf32>
    %166 = arith.select %151, %165, %164 : vector<8x8xi1>, vector<8x8xf32>
    %cst_60 = arith.constant dense<0xFF800000> : vector<8xf32>
    %167 = vector.multi_reduction <maximumf>, %166, %cst_60 [1] : vector<8x8xf32> to vector<8xf32>
    %168 = vector.shape_cast %167 : vector<8xf32> to vector<8x1xf32>
    %169 = vector.broadcast %168 : vector<8x1xf32> to vector<8x8xf32>
    %170 = arith.subf %166, %169 : vector<8x8xf32>
    %171 = math.exp %170 : vector<8x8xf32>
    %cst_61 = arith.constant dense<0.000000e+00> : vector<8xf32>
    %172 = vector.multi_reduction <add>, %171, %cst_61 [1] : vector<8x8xf32> to vector<8xf32>
    %173 = vector.shape_cast %172 : vector<8xf32> to vector<8x1xf32>
    %174 = tpu.reciprocal %173 {approx = true} : vector<8x1xf32> -> vector<8x1xf32>
    %175 = vector.broadcast %174 : vector<8x1xf32> to vector<8x8xf32>
    %176 = arith.mulf %171, %175 : vector<8x8xf32>
    %177 = arith.truncf %176 : vector<8x8xf32> to vector<8x8xbf16>
    %178 = vector.extract_strided_slice %154 {offsets = [0, 0], sizes = [8, 32], strides = [1, 1]} : vector<8x128xf32> to vector<8x32xf32>
    %179 = arith.truncf %178 : vector<8x32xf32> to vector<8x32xbf16>
    %cst_62 = arith.constant dense<0.000000e+00> : vector<8x32xf32>
    %180 = tpu.matmul %177, %179, %cst_62 {dimension_numbers = #tpu.dot_dimension_numbers<[1], [0], [0], [1], [0, 0, 1, 1], [], []>} : vector<8x8xbf16>, vector<8x32xbf16>, vector<8x32xf32> -> vector<8x32xf32>
    %181 = vector.extract_strided_slice %152 {offsets = [0, 32], sizes = [8, 32], strides = [1, 1]} : vector<8x128xf32> to vector<8x32xf32>
    %182 = arith.truncf %181 : vector<8x32xf32> to vector<8x32xbf16>
    %183 = vector.extract_strided_slice %157 {offsets = [32, 0], sizes = [32, 8], strides = [1, 1]} : vector<128x8xf32> to vector<32x8xf32>
    %184 = arith.truncf %183 : vector<32x8xf32> to vector<32x8xbf16>
    %cst_63 = arith.constant dense<0.000000e+00> : vector<8x8xf32>
    %185 = tpu.matmul %182, %184, %cst_63 {dimension_numbers = #tpu.dot_dimension_numbers<[1], [0], [0], [1], [0, 0, 1, 1], [], []>} : vector<8x32xbf16>, vector<32x8xbf16>, vector<8x8xf32> -> vector<8x8xf32>
    %cst_64 = arith.constant 0.176776692 : f32
    %186 = vector.broadcast %cst_64 : f32 to vector<8x8xf32>
    %187 = arith.mulf %185, %186 : vector<8x8xf32>
    %cst_65 = arith.constant -1.000000e+09 : f32
    %188 = vector.broadcast %cst_65 : f32 to vector<8x8xf32>
    %189 = arith.select %151, %188, %187 : vector<8x8xi1>, vector<8x8xf32>
    %cst_66 = arith.constant dense<0xFF800000> : vector<8xf32>
    %190 = vector.multi_reduction <maximumf>, %189, %cst_66 [1] : vector<8x8xf32> to vector<8xf32>
    %191 = vector.shape_cast %190 : vector<8xf32> to vector<8x1xf32>
    %192 = vector.broadcast %191 : vector<8x1xf32> to vector<8x8xf32>
    %193 = arith.subf %189, %192 : vector<8x8xf32>
    %194 = math.exp %193 : vector<8x8xf32>
    %cst_67 = arith.constant dense<0.000000e+00> : vector<8xf32>
    %195 = vector.multi_reduction <add>, %194, %cst_67 [1] : vector<8x8xf32> to vector<8xf32>
    %196 = vector.shape_cast %195 : vector<8xf32> to vector<8x1xf32>
    %197 = tpu.reciprocal %196 {approx = true} : vector<8x1xf32> -> vector<8x1xf32>
    %198 = vector.broadcast %197 : vector<8x1xf32> to vector<8x8xf32>
    %199 = arith.mulf %194, %198 : vector<8x8xf32>
    %200 = arith.truncf %199 : vector<8x8xf32> to vector<8x8xbf16>
    %201 = vector.extract_strided_slice %154 {offsets = [0, 32], sizes = [8, 32], strides = [1, 1]} : vector<8x128xf32> to vector<8x32xf32>
    %202 = arith.truncf %201 : vector<8x32xf32> to vector<8x32xbf16>
    %cst_68 = arith.constant dense<0.000000e+00> : vector<8x32xf32>
    %203 = tpu.matmul %200, %202, %cst_68 {dimension_numbers = #tpu.dot_dimension_numbers<[1], [0], [0], [1], [0, 0, 1, 1], [], []>} : vector<8x8xbf16>, vector<8x32xbf16>, vector<8x32xf32> -> vector<8x32xf32>
    %204 = vector.extract_strided_slice %152 {offsets = [0, 64], sizes = [8, 32], strides = [1, 1]} : vector<8x128xf32> to vector<8x32xf32>
    %205 = arith.truncf %204 : vector<8x32xf32> to vector<8x32xbf16>
    %206 = vector.extract_strided_slice %157 {offsets = [64, 0], sizes = [32, 8], strides = [1, 1]} : vector<128x8xf32> to vector<32x8xf32>
    %207 = arith.truncf %206 : vector<32x8xf32> to vector<32x8xbf16>
    %cst_69 = arith.constant dense<0.000000e+00> : vector<8x8xf32>
    %208 = tpu.matmul %205, %207, %cst_69 {dimension_numbers = #tpu.dot_dimension_numbers<[1], [0], [0], [1], [0, 0, 1, 1], [], []>} : vector<8x32xbf16>, vector<32x8xbf16>, vector<8x8xf32> -> vector<8x8xf32>
    %cst_70 = arith.constant 0.176776692 : f32
    %209 = vector.broadcast %cst_70 : f32 to vector<8x8xf32>
    %210 = arith.mulf %208, %209 : vector<8x8xf32>
    %cst_71 = arith.constant -1.000000e+09 : f32
    %211 = vector.broadcast %cst_71 : f32 to vector<8x8xf32>
    %212 = arith.select %151, %211, %210 : vector<8x8xi1>, vector<8x8xf32>
    %cst_72 = arith.constant dense<0xFF800000> : vector<8xf32>
    %213 = vector.multi_reduction <maximumf>, %212, %cst_72 [1] : vector<8x8xf32> to vector<8xf32>
    %214 = vector.shape_cast %213 : vector<8xf32> to vector<8x1xf32>
    %215 = vector.broadcast %214 : vector<8x1xf32> to vector<8x8xf32>
    %216 = arith.subf %212, %215 : vector<8x8xf32>
    %217 = math.exp %216 : vector<8x8xf32>
    %cst_73 = arith.constant dense<0.000000e+00> : vector<8xf32>
    %218 = vector.multi_reduction <add>, %217, %cst_73 [1] : vector<8x8xf32> to vector<8xf32>
    %219 = vector.shape_cast %218 : vector<8xf32> to vector<8x1xf32>
    %220 = tpu.reciprocal %219 {approx = true} : vector<8x1xf32> -> vector<8x1xf32>
    %221 = vector.broadcast %220 : vector<8x1xf32> to vector<8x8xf32>
    %222 = arith.mulf %217, %221 : vector<8x8xf32>
    %223 = arith.truncf %222 : vector<8x8xf32> to vector<8x8xbf16>
    %224 = vector.extract_strided_slice %154 {offsets = [0, 64], sizes = [8, 32], strides = [1, 1]} : vector<8x128xf32> to vector<8x32xf32>
    %225 = arith.truncf %224 : vector<8x32xf32> to vector<8x32xbf16>
    %cst_74 = arith.constant dense<0.000000e+00> : vector<8x32xf32>
    %226 = tpu.matmul %223, %225, %cst_74 {dimension_numbers = #tpu.dot_dimension_numbers<[1], [0], [0], [1], [0, 0, 1, 1], [], []>} : vector<8x8xbf16>, vector<8x32xbf16>, vector<8x32xf32> -> vector<8x32xf32>
    %227 = vector.extract_strided_slice %152 {offsets = [0, 96], sizes = [8, 32], strides = [1, 1]} : vector<8x128xf32> to vector<8x32xf32>
    %228 = arith.truncf %227 : vector<8x32xf32> to vector<8x32xbf16>
    %229 = vector.extract_strided_slice %157 {offsets = [96, 0], sizes = [32, 8], strides = [1, 1]} : vector<128x8xf32> to vector<32x8xf32>
    %230 = arith.truncf %229 : vector<32x8xf32> to vector<32x8xbf16>
    %cst_75 = arith.constant dense<0.000000e+00> : vector<8x8xf32>
    %231 = tpu.matmul %228, %230, %cst_75 {dimension_numbers = #tpu.dot_dimension_numbers<[1], [0], [0], [1], [0, 0, 1, 1], [], []>} : vector<8x32xbf16>, vector<32x8xbf16>, vector<8x8xf32> -> vector<8x8xf32>
    %cst_76 = arith.constant 0.176776692 : f32
    %232 = vector.broadcast %cst_76 : f32 to vector<8x8xf32>
    %233 = arith.mulf %231, %232 : vector<8x8xf32>
    %cst_77 = arith.constant -1.000000e+09 : f32
    %234 = vector.broadcast %cst_77 : f32 to vector<8x8xf32>
    %235 = arith.select %151, %234, %233 : vector<8x8xi1>, vector<8x8xf32>
    %cst_78 = arith.constant dense<0xFF800000> : vector<8xf32>
    %236 = vector.multi_reduction <maximumf>, %235, %cst_78 [1] : vector<8x8xf32> to vector<8xf32>
    %237 = vector.shape_cast %236 : vector<8xf32> to vector<8x1xf32>
    %238 = vector.broadcast %237 : vector<8x1xf32> to vector<8x8xf32>
    %239 = arith.subf %235, %238 : vector<8x8xf32>
    %240 = math.exp %239 : vector<8x8xf32>
    %cst_79 = arith.constant dense<0.000000e+00> : vector<8xf32>
    %241 = vector.multi_reduction <add>, %240, %cst_79 [1] : vector<8x8xf32> to vector<8xf32>
    %242 = vector.shape_cast %241 : vector<8xf32> to vector<8x1xf32>
    %243 = tpu.reciprocal %242 {approx = true} : vector<8x1xf32> -> vector<8x1xf32>
    %244 = vector.broadcast %243 : vector<8x1xf32> to vector<8x8xf32>
    %245 = arith.mulf %240, %244 : vector<8x8xf32>
    %246 = arith.truncf %245 : vector<8x8xf32> to vector<8x8xbf16>
    %247 = vector.extract_strided_slice %154 {offsets = [0, 96], sizes = [8, 32], strides = [1, 1]} : vector<8x128xf32> to vector<8x32xf32>
    %248 = arith.truncf %247 : vector<8x32xf32> to vector<8x32xbf16>
    %cst_80 = arith.constant dense<0.000000e+00> : vector<8x32xf32>
    %249 = tpu.matmul %246, %248, %cst_80 {dimension_numbers = #tpu.dot_dimension_numbers<[1], [0], [0], [1], [0, 0, 1, 1], [], []>} : vector<8x8xbf16>, vector<8x32xbf16>, vector<8x32xf32> -> vector<8x32xf32>
    %250 = tpu.concatenate %180, %203, %226, %249 in 1 : vector<8x32xf32>, vector<8x32xf32>, vector<8x32xf32>, vector<8x32xf32> -> vector<8x128xf32>
    %251 = arith.truncf %250 : vector<8x128xf32> to vector<8x128xbf16>
    %cst_81 = arith.constant dense<0.000000e+00> : vector<8x128xf32>
    %252 = tpu.matmul %251, %156, %cst_81 {dimension_numbers = #tpu.dot_dimension_numbers<[1], [0], [0], [1], [0, 0, 1, 1], [], []>} : vector<8x128xbf16>, vector<128x128xbf16>, vector<8x128xf32> -> vector<8x128xf32>
    %253 = tpu.concatenate %145, %252 in 0 : vector<8x128xf32>, vector<8x128xf32> -> vector<16x128xf32>
    %254 = arith.addf %3, %253 : vector<16x128xf32>
    %c0_82 = arith.constant 0 : index
    %c0_83 = arith.constant 0 : index
    %c0_84 = arith.constant 0 : index
    %255 = vector.load %arg8[%c0_82, %c0_83, %c0_84] : memref<1x1x128xf32, #tpu.memory_space<vmem>>, vector<1x1x128xf32>
    %256 = vector.shape_cast %255 : vector<1x1x128xf32> to vector<1x128xf32>
    %257 = vector.broadcast %256 : vector<1x128xf32> to vector<16x128xf32>
    %258 = arith.addf %254, %257 : vector<16x128xf32>
    %c0_85 = arith.constant 0 : index
    %c0_86 = arith.constant 0 : index
    %c0_87 = arith.constant 0 : index
    %259 = vector.load %arg9[%c0_85, %c0_86, %c0_87] : memref<1x1x128xf32, #tpu.memory_space<vmem>>, vector<1x1x128xf32>
    %260 = vector.shape_cast %259 : vector<1x1x128xf32> to vector<1x128xf32>
    %c0_88 = arith.constant 0 : index
    %c0_89 = arith.constant 0 : index
    %c0_90 = arith.constant 0 : index
    %261 = vector.load %arg10[%c0_88, %c0_89, %c0_90] : memref<1x1x128xf32, #tpu.memory_space<vmem>>, vector<1x1x128xf32>
    %262 = vector.shape_cast %261 : vector<1x1x128xf32> to vector<1x128xf32>
    %cst_91 = arith.constant dense<0.000000e+00> : vector<16xf32>
    %263 = vector.multi_reduction <add>, %258, %cst_91 [1] : vector<16x128xf32> to vector<16xf32>
    %264 = vector.shape_cast %263 : vector<16xf32> to vector<16x1xf32>
    %cst_92 = arith.constant 1.280000e+02 : f32
    %265 = vector.broadcast %cst_92 : f32 to vector<16x1xf32>
    %266 = arith.divf %264, %265 : vector<16x1xf32>
    %267 = vector.broadcast %266 : vector<16x1xf32> to vector<16x128xf32>
    %268 = arith.subf %258, %267 : vector<16x128xf32>
    %269 = arith.mulf %268, %268 : vector<16x128xf32>
    %cst_93 = arith.constant dense<0.000000e+00> : vector<16xf32>
    %270 = vector.multi_reduction <add>, %269, %cst_93 [1] : vector<16x128xf32> to vector<16xf32>
    %271 = vector.shape_cast %270 : vector<16xf32> to vector<16x1xf32>
    %cst_94 = arith.constant 1.270000e+02 : f32
    %272 = vector.broadcast %cst_94 : f32 to vector<16x1xf32>
    %273 = arith.divf %271, %272 : vector<16x1xf32>
    %274 = math.sqrt %273 : vector<16x1xf32>
    %275 = vector.broadcast %260 : vector<1x128xf32> to vector<16x128xf32>
    %276 = arith.mulf %275, %268 : vector<16x128xf32>
    %cst_95 = arith.constant 9.99999997E-7 : f32
    %277 = vector.broadcast %cst_95 : f32 to vector<16x1xf32>
    %278 = arith.addf %274, %277 : vector<16x1xf32>
    %279 = vector.broadcast %278 : vector<16x1xf32> to vector<16x128xf32>
    %280 = arith.divf %276, %279 : vector<16x128xf32>
    %281 = vector.broadcast %262 : vector<1x128xf32> to vector<16x128xf32>
    %282 = arith.addf %280, %281 : vector<16x128xf32>
    %283 = arith.truncf %282 : vector<16x128xf32> to vector<16x128xbf16>
    %c0_96 = arith.constant 0 : index
    %c0_97 = arith.constant 0 : index
    %c0_98 = arith.constant 0 : index
    %284 = vector.load %arg11[%c0_96, %c0_97, %c0_98] : memref<1x128x256xbf16, #tpu.memory_space<vmem>>, vector<1x128x256xbf16>
    %285 = vector.shape_cast %284 : vector<1x128x256xbf16> to vector<128x256xbf16>
    %cst_99 = arith.constant dense<0.000000e+00> : vector<16x256xf32>
    %286 = tpu.matmul %283, %285, %cst_99 {dimension_numbers = #tpu.dot_dimension_numbers<[1], [0], [0], [1], [0, 0, 1, 1], [], []>} : vector<16x128xbf16>, vector<128x256xbf16>, vector<16x256xf32> -> vector<16x256xf32>
    %c0_100 = arith.constant 0 : index
    %c0_101 = arith.constant 0 : index
    %c0_102 = arith.constant 0 : index
    %287 = vector.load %arg12[%c0_100, %c0_101, %c0_102] : memref<1x1x256xf32, #tpu.memory_space<vmem>>, vector<1x1x256xf32>
    %288 = vector.shape_cast %287 : vector<1x1x256xf32> to vector<1x256xf32>
    %289 = vector.broadcast %288 : vector<1x256xf32> to vector<16x256xf32>
    %290 = arith.addf %286, %289 : vector<16x256xf32>
    %cst_103 = arith.constant 0.000000e+00 : f32
    %291 = vector.broadcast %cst_103 : f32 to vector<16x256xf32>
    %292 = arith.maximumf %290, %291 : vector<16x256xf32>
    %293 = arith.truncf %292 : vector<16x256xf32> to vector<16x256xbf16>
    %c0_104 = arith.constant 0 : index
    %c0_105 = arith.constant 0 : index
    %c0_106 = arith.constant 0 : index
    %294 = vector.load %arg13[%c0_104, %c0_105, %c0_106] : memref<1x256x128xbf16, #tpu.memory_space<vmem>>, vector<1x256x128xbf16>
    %295 = vector.shape_cast %294 : vector<1x256x128xbf16> to vector<256x128xbf16>
    %cst_107 = arith.constant dense<0.000000e+00> : vector<16x128xf32>
    %296 = tpu.matmul %293, %295, %cst_107 {dimension_numbers = #tpu.dot_dimension_numbers<[1], [0], [0], [1], [0, 0, 1, 1], [], []>} : vector<16x256xbf16>, vector<256x128xbf16>, vector<16x128xf32> -> vector<16x128xf32>
    %297 = arith.addf %258, %296 : vector<16x128xf32>
    %c0_108 = arith.constant 0 : index
    %c0_109 = arith.constant 0 : index
    %c0_110 = arith.constant 0 : index
    %298 = vector.load %arg14[%c0_108, %c0_109, %c0_110] : memref<1x1x128xf32, #tpu.memory_space<vmem>>, vector<1x1x128xf32>
    %299 = vector.shape_cast %298 : vector<1x1x128xf32> to vector<1x128xf32>
    %300 = vector.broadcast %299 : vector<1x128xf32> to vector<16x128xf32>
    %301 = arith.addf %297, %300 : vector<16x128xf32>
    %c0_111 = arith.constant 0 : index
    %c0_112 = arith.constant 0 : index
    %302 = vector.load %arg18[%c0_111, %c0_112] : memref<16x128xf32, #tpu.memory_space<vmem>>, vector<16x128xf32>
    tpu.vector_store %arg18[%c0_111, %c0_112], %301 {strides = array<i32>} : memref<16x128xf32, #tpu.memory_space<vmem>>, vector<16x128xf32>,
    %c1_i32 = arith.constant 1 : i32
    %303 = arith.cmpi eq, %arg0, %c1_i32 : i32
    %304 = arith.extui %303 : i1 to i32
    %c0_i32_113 = arith.constant 0 : i32
    %305 = arith.cmpi ne, %304, %c0_i32_113 : i32
    scf.if %305 {
      %c0_114 = arith.constant 0 : index
      %c0_115 = arith.constant 0 : index
      %306 = vector.load %arg15[%c0_114, %c0_115] : memref<1x128xf32, #tpu.memory_space<vmem>>, vector<1x128xf32>
      %c0_116 = arith.constant 0 : index
      %c0_117 = arith.constant 0 : index
      %307 = vector.load %arg16[%c0_116, %c0_117] : memref<1x128xf32, #tpu.memory_space<vmem>>, vector<1x128xf32>
      %cst_118 = arith.constant dense<0.000000e+00> : vector<16xf32>
      %308 = vector.multi_reduction <add>, %301, %cst_118 [1] : vector<16x128xf32> to vector<16xf32>
      %309 = vector.shape_cast %308 : vector<16xf32> to vector<16x1xf32>
      %cst_119 = arith.constant 1.280000e+02 : f32
      %310 = vector.broadcast %cst_119 : f32 to vector<16x1xf32>
      %311 = arith.divf %309, %310 : vector<16x1xf32>
      %312 = vector.broadcast %311 : vector<16x1xf32> to vector<16x128xf32>
      %313 = arith.subf %301, %312 : vector<16x128xf32>
      %314 = arith.mulf %313, %313 : vector<16x128xf32>
      %cst_120 = arith.constant dense<0.000000e+00> : vector<16xf32>
      %315 = vector.multi_reduction <add>, %314, %cst_120 [1] : vector<16x128xf32> to vector<16xf32>
      %316 = vector.shape_cast %315 : vector<16xf32> to vector<16x1xf32>
      %cst_121 = arith.constant 1.270000e+02 : f32
      %317 = vector.broadcast %cst_121 : f32 to vector<16x1xf32>
      %318 = arith.divf %316, %317 : vector<16x1xf32>
      %319 = math.sqrt %318 : vector<16x1xf32>
      %320 = vector.broadcast %306 : vector<1x128xf32> to vector<16x128xf32>
      %321 = arith.mulf %320, %313 : vector<16x128xf32>
      %cst_122 = arith.constant 9.99999997E-7 : f32
      %322 = vector.broadcast %cst_122 : f32 to vector<16x1xf32>
      %323 = arith.addf %319, %322 : vector<16x1xf32>
      %324 = vector.broadcast %323 : vector<16x1xf32> to vector<16x128xf32>
      %325 = arith.divf %321, %324 : vector<16x128xf32>
      %326 = vector.broadcast %307 : vector<1x128xf32> to vector<16x128xf32>
      %327 = arith.addf %325, %326 : vector<16x128xf32>
      %c0_123 = arith.constant 0 : index
      %c0_124 = arith.constant 0 : index
      %328 = vector.load %arg17[%c0_123, %c0_124] : memref<16x128xf32, #tpu.memory_space<vmem>>, vector<16x128xf32>
      tpu.vector_store %arg17[%c0_123, %c0_124], %327 {strides = array<i32>} : memref<16x128xf32, #tpu.memory_space<vmem>>, vector<16x128xf32>,
    } else {
    }
    return
  }
  func.func @transform_0(%arg0: i32) -> (i32, i32) {
    %c0_i32 = arith.constant 0 : i32
    %c0_i32_0 = arith.constant 0 : i32
    %c0_i32_1 = arith.constant 0 : i32
    return %c0_i32, %c0_i32_0 : i32, i32
  }
  func.func @transform_1(%arg0: i32) -> (i32, i32, i32) {
    %c0_i32 = arith.constant 0 : i32
    %c0_i32_0 = arith.constant 0 : i32
    %c0_i32_1 = arith.constant 0 : i32
    %c0_i32_2 = arith.constant 0 : i32
    return %c0_i32, %c0_i32_0, %c0_i32_1 : i32, i32, i32
  }
  func.func @transform_2(%arg0: i32) -> (i32, i32, i32) {
    %c0_i32 = arith.constant 0 : i32
    %c0_i32_0 = arith.constant 0 : i32
    %c0_i32_1 = arith.constant 0 : i32
    return %arg0, %c0_i32, %c0_i32_0 : i32, i32, i32
  }
  func.func @transform_3(%arg0: i32) -> (i32, i32, i32) {
    %c0_i32 = arith.constant 0 : i32
    %c0_i32_0 = arith.constant 0 : i32
    %c0_i32_1 = arith.constant 0 : i32
    return %arg0, %c0_i32, %c0_i32_0 : i32, i32, i32
  }
  func.func @transform_4(%arg0: i32) -> (i32, i32, i32) {
    %c0_i32 = arith.constant 0 : i32
    %c0_i32_0 = arith.constant 0 : i32
    %c0_i32_1 = arith.constant 0 : i32
    return %arg0, %c0_i32, %c0_i32_0 : i32, i32, i32
  }
  func.func @transform_5(%arg0: i32) -> (i32, i32, i32) {
    %c0_i32 = arith.constant 0 : i32
    %c0_i32_0 = arith.constant 0 : i32
    %c0_i32_1 = arith.constant 0 : i32
    return %arg0, %c0_i32, %c0_i32_0 : i32, i32, i32
  }
  func.func @transform_6(%arg0: i32) -> (i32, i32, i32) {
    %c0_i32 = arith.constant 0 : i32
    %c0_i32_0 = arith.constant 0 : i32
    %c0_i32_1 = arith.constant 0 : i32
    return %arg0, %c0_i32, %c0_i32_0 : i32, i32, i32
  }
  func.func @transform_7(%arg0: i32) -> (i32, i32, i32) {
    %c0_i32 = arith.constant 0 : i32
    %c0_i32_0 = arith.constant 0 : i32
    %c0_i32_1 = arith.constant 0 : i32
    return %arg0, %c0_i32, %c0_i32_0 : i32, i32, i32
  }
  func.func @transform_8(%arg0: i32) -> (i32, i32, i32) {
    %c0_i32 = arith.constant 0 : i32
    %c0_i32_0 = arith.constant 0 : i32
    %c0_i32_1 = arith.constant 0 : i32
    return %arg0, %c0_i32, %c0_i32_0 : i32, i32, i32
  }
  func.func @transform_9(%arg0: i32) -> (i32, i32, i32) {
    %c0_i32 = arith.constant 0 : i32
    %c0_i32_0 = arith.constant 0 : i32
    %c0_i32_1 = arith.constant 0 : i32
    return %arg0, %c0_i32, %c0_i32_0 : i32, i32, i32
  }
  func.func @transform_10(%arg0: i32) -> (i32, i32, i32) {
    %c0_i32 = arith.constant 0 : i32
    %c0_i32_0 = arith.constant 0 : i32
    %c0_i32_1 = arith.constant 0 : i32
    return %arg0, %c0_i32, %c0_i32_0 : i32, i32, i32
  }
  func.func @transform_11(%arg0: i32) -> (i32, i32, i32) {
    %c0_i32 = arith.constant 0 : i32
    %c0_i32_0 = arith.constant 0 : i32
    %c0_i32_1 = arith.constant 0 : i32
    return %arg0, %c0_i32, %c0_i32_0 : i32, i32, i32
  }
  func.func @transform_12(%arg0: i32) -> (i32, i32, i32) {
    %c0_i32 = arith.constant 0 : i32
    %c0_i32_0 = arith.constant 0 : i32
    %c0_i32_1 = arith.constant 0 : i32
    return %arg0, %c0_i32, %c0_i32_0 : i32, i32, i32
  }
  func.func @transform_13(%arg0: i32) -> (i32, i32, i32) {
    %c0_i32 = arith.constant 0 : i32
    %c0_i32_0 = arith.constant 0 : i32
    %c0_i32_1 = arith.constant 0 : i32
    return %arg0, %c0_i32, %c0_i32_0 : i32, i32, i32
  }
  func.func @transform_14(%arg0: i32) -> (i32, i32) {
    %c0_i32 = arith.constant 0 : i32
    %c0_i32_0 = arith.constant 0 : i32
    %c0_i32_1 = arith.constant 0 : i32
    return %c0_i32, %c0_i32_0 : i32, i32
  }
  func.func @transform_15(%arg0: i32) -> (i32, i32) {
    %c0_i32 = arith.constant 0 : i32
    %c0_i32_0 = arith.constant 0 : i32
    %c0_i32_1 = arith.constant 0 : i32
    return %c0_i32, %c0_i32_0 : i32, i32
  }
  func.func @transform_16(%arg0: i32) -> (i32, i32) {
    %c0_i32 = arith.constant 0 : i32
    %c0_i32_0 = arith.constant 0 : i32
    %c0_i32_1 = arith.constant 0 : i32
    return %c0_i32, %c0_i32_0 : i32, i32
  }
}

</mosaic_0001>

<bundles_post_ra>
// kernel: tpu_custom_call.1
= control target key start
LH: loop header
LB: loop body
LE: loop exit
PB: predicated region body
PF: predicated region fallthrough
CT: control target
= control target key end

     0   :  { %s4863_s0 = inlined_call_operand.hbm [shape: f32[16,128], index: 0, kind: input, shape index: {}]   ;;  %s4864_s1 = inlined_call_operand.hbm [shape: s32[2,1,8], index: 1, kind: input, shape index: {}]   ;;  %s4865_s2 = inlined_call_operand.hbm [shape: f32[2,1,128], index: 2, kind: input, shape index: {}]   ;;  %s4866_s3 = inlined_call_operand.hbm [shape: f32[2,1,128], index: 3, kind: input, shape index: {}]   ;;  %s4867_s4 = inlined_call_operand.hbm [shape: bf16[2,128,384], index: 4, kind: input, shape index: {}]   ;;  %s4868_s5 = inlined_call_operand.vmem [shape: f32[2,1,384], index: 5, kind: input, shape index: {}]   ;;  %s4869_s6 = inlined_call_operand.hbm [shape: bf16[2,128,128], index: 6, kind: input, shape index: {}]   ;;  %s4870_s7 = inlined_call_operand.vmem [shape: f32[2,1,128], index: 7, kind: input, shape index: {}]   ;;  %s4871_s8 = inlined_call_operand.vmem [shape: f32[2,1,128], index: 8, kind: input, shape index: {}]   ;;  %s4872_s9 = inlined_call_operand.vmem [shape: f32[2,1,128], index: 9, kind: input, shape index: {}]   ;;  %s4873_s10 = inlined_call_operand.hbm [shape: bf16[2,128,256], index: 10, kind: input, shape index: {}]   ;;  %s4874_s11 = inlined_call_operand.vmem [shape: f32[2,1,256], index: 11, kind: input, shape index: {}]   ;;  %s4875_s12 = inlined_call_operand.hbm [shape: bf16[2,256,128], index: 12, kind: input, shape index: {}]   ;;  %s4876_s13 = inlined_call_operand.vmem [shape: f32[2,1,128], index: 13, kind: input, shape index: {}]   ;;  %s4877_s14 = inlined_call_operand.vmem [shape: f32[1,128], index: 14, kind: input, shape index: {}]   ;;  %s4878_s15 = inlined_call_operand.vmem [shape: f32[1,128], index: 15, kind: input, shape index: {}]   ;;  %s4879_s16 = inlined_call_operand.hbm [shape: f32[16,128], index: 16, kind: output, shape index: {}]  }
   0x1   :  { %4902 = sst [smem:[#allocation22_spill]] %s4863_s0 }
   0x2   :  { %4903 = sst [smem:[#allocation23_spill]] %s4864_s1 }
   0x3   :  { %4904 = sst [smem:[#allocation24_spill]] %s4865_s2 }
   0x4   :  { %4905 = sst [smem:[#allocation25_spill]] %s4866_s3 }
   0x5   :  { %4906 = sst [smem:[#allocation26_spill]] %s4867_s4 }
   0x6   :  { %4907 = sst [smem:[#allocation27_spill]] %s4868_s5 }
   0x7   :  { %4908 = sst [smem:[#allocation28_spill]] %s4869_s6 }
   0x8   :  { %4909 = sst [smem:[#allocation29_spill]] %s4871_s8 }
   0x9   :  { %4910 = sst [smem:[#allocation30_spill]] %s4872_s9 }
   0xa   :  { %4911 = sst [smem:[#allocation31_spill]] %s4873_s10 }
   0xb   :  { %4912 = sst [smem:[#allocation32_spill]] %s4874_s11 }
   0xc   :  { %4913 = sst [smem:[#allocation33_spill]] %s4876_s13 }
   0xd   :  { %4914 = sst [smem:[#allocation34_spill]] %s4877_s14 }
   0xe   :  { %4915 = sst [smem:[#allocation35_spill]] %s4878_s15 }
   0xf   :  { %4916 = sst [smem:[#allocation36_spill]] %s4879_s16 }
  0x10   :  { %21 = vsyncpa [#allocation4], 0 }
  0x11   :  { %22 = vsyncpa [#allocation7], 0 }
  0x12   :  { %23 = vsyncpa [#allocation5], 0  ;;  %s4030_s21 = smov 0   ;;  %s4032_s22 = smov 0  }
  0x13   :  { %s4034_s23 = smov 0   ;;  %s4036_s24 = smov 0  }
  0x14 LB: > { %4917 = sst [smem:[#allocation19_spill]] %s3914_s23  ;;  %s4049_s25 = sadd.s32 4294967295, %s3918_s24   ;;  %s3918_s24 = sphi %s4036_s24, %s4970_s24   ;;  %s3914_s23 = sphi %s4034_s23, %s4972_s23   ;;  %s3910_s22 = sphi %s4032_s22, %s4974_s22   ;;  %s3906_s21 = sphi %s4030_s21, %s4973_s21  }
  0x15   : > { %s4052_s26 = sadd.s32 1, %s3918_s24   ;;  %s78_s28 = sadd.s32 1, %s3914_s23 }
  0x16   : > { %4918 = sst [smem:[#allocation20_spill]] %s4052_s26  ;;  %s75_s27 = ssub.s32 %s3918_s24, %s4052_s26 }
  0x17   : > { %p76_p0 = scmp.eq.s32.totalorder %s75_s27, 0  ;;  %p85_p1 = scmp.ne.s32.totalorder %s3914_s23, %s3910_s22 }
  0x18   : > { %p86_p2 = scmp.eq.s32.totalorder %s3918_s24, 0  ;;  %p91_p3 = scmp.ne.s32.totalorder %s3910_s22, %s3906_s21 }
  0x19   : > { %s4062_s29 = scalar_select %p76_p0, %s3914_s23, %s78_s28  }
  0x1a   : > { %p4064_p4 = por %p86_p2, %p85_p1  ;;  %p4885_p5 = scmp.eq.s32.totalorder %s4049_s25, 0 }
  0x1b   : > { %4919 = sst [smem:[#allocation21_spill]] %s4062_s29  ;;  %p2979_p6 = scmp.ge.s32.totalorder %s3918_s24, 1 }
  0x1c   : > { %p451_p7 = scmp.lt.s32.totalorder %s3918_s24, 3  ;;  %p4073_p8 = por %p4885_p5, %p91_p3 }
  0x1d   : > { %s3920_s18 = smov [#allocation3]   ;;  %p3416_p13 = scmp.lt.s32.totalorder %s3918_s24, 2 }
  0x1e   : > { %s4921_s0 = scalar_select %p4073_p8, 1, 0 }
  0x1f   : > { %p4078_p10 = pnand %p2979_p6, %p451_p7  ;;  %s463_s19 = sshll.u32 %s3920_s18, 4  ;;  %s464_s19 = int_to_ptr.vmem [resolvable:$true] %s463_s19 }
  0x20   : > { %s496_s21 = sand.u32 1, %s3918_s24   ;;  %s4093_s27 = sand.u32 1, %s3914_s23  }
  0x21   : > { %s4922_s17 = scalar_select %p4078_p10, 1, 0 }
  0x22   : > { %p3388_p11 = pneg %p4078_p10  ;;  %p4097_p0 = pnand %p3416_p13, %p4064_p4 }
  0x23   : > { %s4925_s26 = sld [smem:[#allocation22_spill]] }
  0x24   : > { %p4086_p12 = pnand %p3388_p11, %p4885_p5 }
  0x25   : > { %s4924_s28 = scalar_select %p4097_p0, 1, 0 }
  0x26   : > { %s4923_s20 = scalar_select %p4086_p12, 1, 0 }
  0x27   : > { %p4889_p2 = pneg %p4086_p12 }
  0x29   : > { %s3610_s16 = scalar_lea.hbm %s4925_s26, 256 }
  0x2a   : > { %p3611_p1 = scmp.ne.s32.totalorder %s4925_s26, %s3610_s16  ;;  %p3617_p4 = scmp.lt.u32.totalorder %s3610_s16, %s4925_s26 }
  0x2c   : > { %p3613_p3 = pnand %p4889_p2, %p3611_p1 }
  0x2e   : > { %p3614_p6 = pneg %p3613_p3 }
  0x30   : > { %p3619_p7 = pnand %p3617_p4, %p3614_p6 }
  0x32   : > { %3622 = shalt.err (!%p3619_p7)
}
  0x33   : > { %s3623_s13 = scalar_lea.vmem %s464_s19, 256  ;;  %p3631_p5 = scmp.lt.s32.totalorder %s464_s19, %s464_s19 }
  0x34   : > { %p3624_p11 = scmp.ne.s32.totalorder %s464_s19, %s3623_s13  ;;  %p3632_p8 = scmp.lt.s32.totalorder %s3623_s13, %s3623_s13 }
  0x36   : > { %p3626_p13 = pnand %p3624_p11, %p4889_p2  ;;  %p3633_p10 = por %p3632_p8, %p3631_p5 }
  0x38   : > { %p3627_p9 = pneg %p3626_p13 }
  0x3a   : > { %p3634_p0 = pnand %p3633_p10, %p3627_p9 }
  0x3c   : > { %3637 = shalt.err (!%p3634_p0)
}
  0x3d   : > { %s4892_s14 = smov 128   ;;  %s4893_s15 = smov 8  }
  0x3e   : > { %3391 = dma.hbm_to_vmem [thread:$0]  (!%p4086_p12), %s4925_s26, 256, %s464_s19, [#allocation4], %s4892_s14, %s4892_s14, %s4893_s15  }
  0x3f   : > { %s2983_s29 = sshll.u32 %s3918_s24, 4  ;;  %s4926_s2 = sld [smem:[#allocation24_spill]] }
  0x40   : > { %s499_s11 = scalar_lea.vmem [#allocation8], %s4093_s27  ;;  %s4137_s9 = scalar_lea.sflag [#allocation4], %s496_s21 }
  0x41   : > { %s506_s5 = sshll.u32 %s499_s11, 4  ;;  %p4927_p8 = scmp.ne.s32.totalorder %s4924_s28, 0  ;;  %s4135_s5 = int_to_ptr.vmem [resolvable:$true] %s506_s5 }
  0x43   : > { %p4143_p9 = pneg %p4927_p8 }
  0x45   : > { %s4132_s30 = scalar_lea.hbm %s4926_s2, %s2983_s29  ;;  %s3643_s13 = scalar_lea.hbm %s4926_s2, 32 }
  0x46   : > { %s3638_s8 = scalar_lea.hbm %s4132_s30, 16  ;;  %p3644_p1 = scmp.lt.u32.totalorder %s4132_s30, %s4926_s2 }
  0x47   : > { %p3639_p5 = scmp.ne.s32.totalorder %s4132_s30, %s3638_s8  ;;  %p3645_p3 = scmp.lt.u32.totalorder %s3643_s13, %s3638_s8 }
  0x48   : > { %s4928_s19 = scalar_select %p4143_p9, 1, 0 }
  0x49   : > { %p3641_p10 = pnand %p4143_p9, %p3639_p5  ;;  %p3646_p6 = por %p3645_p3, %p3644_p1 }
  0x4a   : > { %p3647_p4 = scmp.lt.u32.totalorder %s3638_s8, %s4132_s30 }
  0x4b   : > { %p3642_p0 = pneg %p3641_p10 }
  0x4c   : > { %p3648_p7 = por %p3647_p4, %p3646_p6 }
  0x4e   : > { %p3649_p11 = pnand %p3648_p7, %p3642_p0 }
  0x50   : > { %3652 = shalt.err (!%p3649_p11)
}
  0x51   : > { %s3653_s21 = scalar_lea.vmem %s4135_s5, 16  ;;  %s3923_s16 = smov [#allocation8]  }
  0x52   : > { %p3654_p13 = scmp.ne.s32.totalorder %s4135_s5, %s3653_s21  ;;  %s3658_s23 = sshll.u32 %s3923_s16, 4  ;;  %s3659_s23 = int_to_ptr.vmem [resolvable:$false] %s3658_s23 }
  0x53   : > { %s3660_s11 = scalar_lea.vmem %s3659_s23, 32  ;;  %p3661_p2 = scmp.lt.s32.totalorder %s4135_s5, %s3659_s23 }
  0x54   : > { %p3656_p5 = pnand %p3654_p13, %p4143_p9  ;;  %p3662_p12 = scmp.lt.s32.totalorder %s3660_s11, %s3653_s21 }
  0x56   : > { %p3657_p10 = pneg %p3656_p5  ;;  %p3663_p1 = por %p3662_p12, %p3661_p2 }
  0x58   : > { %p3664_p3 = pnand %p3663_p1, %p3657_p10 }
  0x5a   : > { %3667 = shalt.err (!%p3664_p3)
}
  0x5b   : > { %3398 = dma.hbm_to_vmem [thread:$0]  (!%p4927_p8), %s4132_s30, 16, %s4135_s5, %s4137_s9  }
  0x5c   : > { %s4929_s3 = sld [smem:[#allocation25_spill]]  ;;  %s516_s21 = scalar_lea.vmem [#allocation9], %s4093_s27 }
  0x5d   : > { %s523_s16 = sshll.u32 %s516_s21, 4  ;;  %s3360_s23 = smul.u32 192, %s4093_s27  ;;  %s524_s16 = int_to_ptr.vmem [resolvable:$true] %s523_s16 }
  0x62   : > { %s4172_s18 = scalar_lea.hbm %s4929_s3, %s2983_s29  ;;  %s3673_s14 = scalar_lea.hbm %s4929_s3, 32 }
  0x63   : > { %s3668_s11 = scalar_lea.hbm %s4172_s18, 16  ;;  %p3674_p6 = scmp.lt.u32.totalorder %s4172_s18, %s4929_s3 }
  0x64   : > { %p3669_p12 = scmp.ne.s32.totalorder %s4172_s18, %s3668_s11  ;;  %p3675_p4 = scmp.lt.u32.totalorder %s3673_s14, %s3668_s11 }
  0x65   : > { %p3677_p11 = scmp.lt.u32.totalorder %s3668_s11, %s4172_s18 }
  0x66   : > { %p3671_p2 = pnand %p3669_p12, %p4143_p9  ;;  %p3676_p7 = por %p3675_p4, %p3674_p6 }
  0x68   : > { %p3672_p0 = pneg %p3671_p2  ;;  %p3678_p13 = por %p3677_p11, %p3676_p7 }
  0x6a   : > { %p3679_p5 = pnand %p3678_p13, %p3672_p0 }
  0x6c   : > { %3682 = shalt.err (!%p3679_p5)
}
  0x6d   : > { %s3683_s13 = scalar_lea.vmem %s524_s16, 16  ;;  %s3924_s21 = smov [#allocation9]  }
  0x6e   : > { %p3684_p10 = scmp.ne.s32.totalorder %s524_s16, %s3683_s13  ;;  %s3688_s15 = sshll.u32 %s3924_s21, 4  ;;  %s3689_s15 = int_to_ptr.vmem [resolvable:$false] %s3688_s15 }
  0x6f   : > { %s3690_s5 = scalar_lea.vmem %s3689_s15, 32  ;;  %p3691_p12 = scmp.lt.s32.totalorder %s524_s16, %s3689_s15 }
  0x70   : > { %p3686_p1 = pnand %p3684_p10, %p4143_p9  ;;  %p3692_p2 = scmp.lt.s32.totalorder %s3690_s5, %s3683_s13 }
  0x72   : > { %p3687_p3 = pneg %p3686_p1  ;;  %p3693_p8 = por %p3692_p2, %p3691_p12 }
  0x74   : > { %p3694_p4 = pnand %p3693_p8, %p3687_p3 }
  0x76   : > { %3697 = shalt.err (!%p3694_p4)
}
  0x77   : > { %p4930_p6 = scmp.ne.s32.totalorder %s4924_s28, 0  ;;  %s3361_s14 = smul.u32 3072, %s3918_s24 }
  0x78   : > { %s534_s11 = scalar_lea.vmem [#allocation10], %s3360_s23  ;;  %s4931_s4 = sld [smem:[#allocation26_spill]] }
  0x79   : > { %3401 = dma.hbm_to_vmem [thread:$0]  (!%p4930_p6), %s4172_s18, 16, %s524_s16, %s4137_s9  }
  0x7a   : > { %s541_s30 = sshll.u32 %s534_s11, 4  ;;  %s2986_s15 = sshll.u32 %s4093_s27, 6  ;;  %s4200_s30 = int_to_ptr.vmem [resolvable:$true] %s541_s30 }
  0x7e   : > { %s4198_s21 = scalar_lea.hbm %s4931_s4, %s3361_s14  ;;  %s3703_s23 = scalar_lea.hbm %s4931_s4, 6144 }
  0x7f   : > { %s3698_s13 = scalar_lea.hbm %s4198_s21, 3072  ;;  %p3704_p11 = scmp.lt.u32.totalorder %s4198_s21, %s4931_s4 }
  0x80   : > { %p3699_p8 = scmp.ne.s32.totalorder %s4198_s21, %s3698_s13  ;;  %p3705_p13 = scmp.lt.u32.totalorder %s3703_s23, %s3698_s13 }
  0x81   : > { %p3707_p10 = scmp.lt.u32.totalorder %s3698_s13, %s4198_s21 }
  0x82   : > { %p3701_p0 = pnand %p3699_p8, %p4143_p9  ;;  %p3706_p5 = por %p3705_p13, %p3704_p11 }
  0x84   : > { %p3702_p7 = pneg %p3701_p0  ;;  %p3708_p1 = por %p3707_p10, %p3706_p5 }
  0x86   : > { %p3709_p3 = pnand %p3708_p1, %p3702_p7 }
  0x88   : > { %3712 = shalt.err (!%p3709_p3)
}
  0x89   : > { %s3713_s14 = scalar_lea.vmem %s4200_s30, 3072  ;;  %s3925_s8 = smov [#allocation10]  }
  0x8a   : > { %p3714_p12 = scmp.ne.s32.totalorder %s4200_s30, %s3713_s14  ;;  %s3718_s29 = sshll.u32 %s3925_s8, 4  ;;  %s3719_s29 = int_to_ptr.vmem [resolvable:$false] %s3718_s29 }
  0x8b   : > { %s3720_s18 = scalar_lea.vmem %s3719_s29, 6144  ;;  %p3721_p8 = scmp.lt.s32.totalorder %s4200_s30, %s3719_s29 }
  0x8c   : > { %p3716_p2 = pnand %p3714_p12, %p4143_p9  ;;  %p3722_p0 = scmp.lt.s32.totalorder %s3720_s18, %s3713_s14 }
  0x8e   : > { %p3717_p4 = pneg %p3716_p2  ;;  %p3723_p11 = por %p3722_p0, %p3721_p8 }
  0x90   : > { %p3724_p13 = pnand %p3723_p11, %p3717_p4 }
  0x92   : > { %3727 = shalt.err (!%p3724_p13)
}
  0x93   : > { %s3926_s13 = smov 192   ;;  %s3927_s16 = smov 12  }
  0x94   : > { %3404 = dma.hbm_to_vmem [thread:$0]  (!%p4930_p6), %s4198_s21, 3072, %s4200_s30, %s4137_s9, %s3926_s13, %s3926_s13, %s3927_s16  }
  0x95   : > { %s3096_s23 = sshll.u32 %s3918_s24, 10  ;;  %s4932_s6 = sld [smem:[#allocation28_spill]] }
  0x96   : > { %s562_s8 = scalar_lea.vmem [#allocation11], %s2986_s15  ;;  %s4897_s18 = sshll.u32 %s4093_s27, 7 }
  0x97   : > { %s569_s29 = sshll.u32 %s562_s8, 4  ;;  %s4233_s29 = int_to_ptr.vmem [resolvable:$true] %s569_s29 }
  0x9b   : > { %s4229_s14 = scalar_lea.hbm %s4932_s6, %s3096_s23  ;;  %s3733_s13 = scalar_lea.hbm %s4932_s6, 2048 }
  0x9c   : > { %s3728_s2 = scalar_lea.hbm %s4229_s14, 1024  ;;  %p3734_p1 = scmp.lt.u32.totalorder %s4229_s14, %s4932_s6 }
  0x9d   : > { %p3729_p7 = scmp.ne.s32.totalorder %s4229_s14, %s3728_s2  ;;  %p3735_p3 = scmp.lt.u32.totalorder %s3733_s13, %s3728_s2 }
  0x9e   : > { %p3737_p2 = scmp.lt.u32.totalorder %s3728_s2, %s4229_s14 }
  0x9f   : > { %p3731_p5 = pnand %p3729_p7, %p4143_p9  ;;  %p3736_p12 = por %p3735_p3, %p3734_p1 }
  0xa1   : > { %p3732_p10 = pneg %p3731_p5  ;;  %p3738_p4 = por %p3737_p2, %p3736_p12 }
  0xa3   : > { %p3739_p8 = pnand %p3738_p4, %p3732_p10 }
  0xa5   : > { %3742 = shalt.err (!%p3739_p8)
}
  0xa6   : > { %s3743_s15 = scalar_lea.vmem %s4233_s29, 1024  ;;  %s3928_s5 = smov [#allocation11]  }
  0xa7   : > { %p3744_p0 = scmp.ne.s32.totalorder %s4233_s29, %s3743_s15  ;;  %s3748_s11 = sshll.u32 %s3928_s5, 4  ;;  %s3749_s11 = int_to_ptr.vmem [resolvable:$false] %s3748_s11 }
  0xa8   : > { %s3750_s8 = scalar_lea.vmem %s3749_s11, 2048  ;;  %p3751_p7 = scmp.lt.s32.totalorder %s4233_s29, %s3749_s11 }
  0xa9   : > { %p3746_p11 = pnand %p3744_p0, %p4143_p9  ;;  %p3752_p5 = scmp.lt.s32.totalorder %s3750_s8, %s3743_s15 }
  0xab   : > { %p3747_p13 = pneg %p3746_p11  ;;  %p3753_p1 = por %p3752_p5, %p3751_p7 }
  0xad   : > { %p3754_p3 = pnand %p3753_p1, %p3747_p13 }
  0xaf   : > { %3757 = shalt.err (!%p3754_p3)
}
  0xb0   : > { %s4895_s2 = smov 64   ;;  %s4896_s30 = smov 4  }
  0xb1   : > { %3407 = dma.hbm_to_vmem [thread:$0]  (!%p4930_p6), %s4229_s14, 1024, %s4233_s29, %s4137_s9, %s4895_s2, %s4895_s2, %s4896_s30  }
  0xb2   : > { %s4898_s21 = sshll.u32 %s3918_s24, 11  ;;  %s4933_s10 = sld [smem:[#allocation31_spill]] }
  0xb3   : > { %s601_s15 = scalar_lea.vmem [#allocation12], %s4897_s18 }
  0xb4   : > { %s608_s5 = sshll.u32 %s601_s15, 4  ;;  %s4271_s5 = int_to_ptr.vmem [resolvable:$true] %s608_s5 }
  0xb8   : > { %s4267_s23 = scalar_lea.hbm %s4933_s10, %s4898_s21  ;;  %s3763_s8 = scalar_lea.hbm %s4933_s10, 4096 }
  0xb9   : > { %s3758_s11 = scalar_lea.hbm %s4267_s23, 2048  ;;  %p3764_p4 = scmp.lt.u32.totalorder %s4267_s23, %s4933_s10 }
  0xba   : > { %p3759_p10 = scmp.ne.s32.totalorder %s4267_s23, %s3758_s11  ;;  %p3765_p8 = scmp.lt.u32.totalorder %s3763_s8, %s3758_s11 }
  0xbb   : > { %p3767_p11 = scmp.lt.u32.totalorder %s3758_s11, %s4267_s23 }
  0xbc   : > { %p3761_p12 = pnand %p3759_p10, %p4143_p9  ;;  %p3766_p0 = por %p3765_p8, %p3764_p4 }
  0xbe   : > { %p3762_p2 = pneg %p3761_p12  ;;  %p3768_p13 = por %p3767_p11, %p3766_p0 }
  0xc0   : > { %p3769_p7 = pnand %p3768_p13, %p3762_p2 }
  0xc2   : > { %3772 = shalt.err (!%p3769_p7)
}
  0xc3   : > { %s3773_s15 = scalar_lea.vmem %s4271_s5, 2048  ;;  %s3931_s14 = smov [#allocation12]  }
  0xc4   : > { %p3774_p5 = scmp.ne.s32.totalorder %s4271_s5, %s3773_s15  ;;  %s3778_s29 = sshll.u32 %s3931_s14, 4  ;;  %s3779_s29 = int_to_ptr.vmem [resolvable:$false] %s3778_s29 }
  0xc5   : > { %s3780_s13 = scalar_lea.vmem %s3779_s29, 4096  ;;  %p3781_p10 = scmp.lt.s32.totalorder %s4271_s5, %s3779_s29 }
  0xc6   : > { %p3776_p1 = pnand %p3774_p5, %p4143_p9  ;;  %p3782_p12 = scmp.lt.s32.totalorder %s3780_s13, %s3773_s15 }
  0xc8   : > { %p3777_p3 = pneg %p3776_p1  ;;  %p3783_p4 = por %p3782_p12, %p3781_p10 }
  0xca   : > { %p3784_p8 = pnand %p3783_p4, %p3777_p3 }
  0xcc   : > { %3787 = shalt.err (!%p3784_p8)
}
  0xcd   : > { %s4934_s11 = smov 8   ;;  %s4935_s8 = smov 128  }
  0xce   : > { %3410 = dma.hbm_to_vmem [thread:$0]  (!%p4930_p6), %s4267_s23, 2048, %s4271_s5, %s4137_s9, %s4935_s8, %s4935_s8, %s4934_s11  }
  0xcf   : > { %s3932_s16 = smov [#allocation6]   ;;  %s4936_s1 = sld [smem:[#allocation23_spill]] }
  0xd0   : > { %s476_s2 = sshll.u32 %s3932_s16, 4  ;;  %p4937_p0 = scmp.ne.s32.totalorder %s4923_s20, 0  ;;  %s477_s2 = int_to_ptr.vmem [resolvable:$true] %s476_s2 }
  0xd2   : > { %p4938_p11 = pneg %p4937_p0 }
  0xd5   : > { %s3788_s15 = scalar_lea.hbm %s4936_s1, 32 }
  0xd6   : > { %p3789_p2 = scmp.ne.s32.totalorder %s4936_s1, %s3788_s15  ;;  %p3795_p5 = scmp.lt.u32.totalorder %s3788_s15, %s4936_s1 }
  0xd8   : > { %p3791_p13 = pnand %p3789_p2, %p4938_p11 }
  0xda   : > { %p3792_p7 = pneg %p3791_p13 }
  0xdc   : > { %p3797_p1 = pnand %p3795_p5, %p3792_p7 }
  0xde   : > { %3800 = shalt.err (!%p3797_p1)
}
  0xdf   : > { %s3801_s23 = scalar_lea.vmem %s477_s2, 32  ;;  %p4939_p10 = pmov %p4938_p11 }
  0xe0   : > { %p3802_p3 = scmp.ne.s32.totalorder %s477_s2, %s3801_s23  ;;  %p3809_p8 = scmp.lt.s32.totalorder %s477_s2, %s477_s2 }
  0xe1   : > { %p3810_p6 = scmp.lt.s32.totalorder %s3801_s23, %s3801_s23 }
  0xe2   : > { %p3804_p12 = pnand %p3802_p3, %p4939_p10 }
  0xe3   : > { %p3811_p9 = por %p3810_p6, %p3809_p8 }
  0xe4   : > { %p3805_p4 = pneg %p3804_p12 }
  0xe6   : > { %p3812_p2 = pnand %p3811_p9, %p3805_p4 }
  0xe8   : > { %3815 = shalt.err (!%p3812_p2)
}
  0xe9   : > { %s3933_s30 = smov 16   ;;  %s3934_s18 = smov 1  }
  0xea   : > { %3394 = dma.hbm_to_vmem [thread:$0]  (!%p4937_p0), %s4936_s1, 32, %s477_s2, [#allocation7], %s3933_s30, %s3933_s30, %s3934_s18  }
  0xeb   : > { %s4940_s11 = sshll.u32 %s3918_s24, 11  ;;  %s4941_s15 = sshll.u32 %s4093_s27, 7 }
  0xec   : > { %s4323_s14 = scalar_lea.hbm %s4875_s12, %s4940_s11  ;;  %s629_s29 = scalar_lea.vmem [#allocation13], %s4941_s15 }
  0xed   : > { %s636_s13 = sshll.u32 %s629_s29, 4  ;;  %s3816_s20 = scalar_lea.hbm %s4323_s14, 2048  ;;  %s4327_s13 = int_to_ptr.vmem [resolvable:$true] %s636_s13 }
  0xee   : > { %p3817_p9 = scmp.ne.s32.totalorder %s4323_s14, %s3816_s20  ;;  %p4942_p6 = scmp.ne.s32.totalorder %s4928_s19, 0 }
  0xef   : > { %s3821_s23 = scalar_lea.hbm %s4875_s12, 4096  ;;  %p3822_p13 = scmp.lt.u32.totalorder %s4323_s14, %s4875_s12 }
  0xf0   : > { %p3819_p11 = pnand %p3817_p9, %p4942_p6  ;;  %p3823_p7 = scmp.lt.u32.totalorder %s3821_s23, %s3816_s20 }
  0xf1   : > { %p3825_p1 = scmp.lt.u32.totalorder %s3816_s20, %s4323_s14 }
  0xf2   : > { %p3820_p0 = pneg %p3819_p11  ;;  %p3824_p5 = por %p3823_p7, %p3822_p13 }
  0xf4   : > { %p3826_p3 = por %p3825_p1, %p3824_p5 }
  0xf6   : > { %p3827_p10 = pnand %p3826_p3, %p3820_p0 }
  0xf8   : > { %3830 = shalt.err (!%p3827_p10)
}
  0xf9   : > { %s3831_s27 = scalar_lea.vmem %s4327_s13, 2048  ;;  %s3935_s21 = smov [#allocation13]  }
  0xfa   : > { %p3832_p12 = scmp.ne.s32.totalorder %s4327_s13, %s3831_s27  ;;  %s3836_s5 = sshll.u32 %s3935_s21, 4  ;;  %s3837_s5 = int_to_ptr.vmem [resolvable:$false] %s3836_s5 }
  0xfb   : > { %s3838_s11 = scalar_lea.vmem %s3837_s5, 4096  ;;  %p3839_p2 = scmp.lt.s32.totalorder %s4327_s13, %s3837_s5 }
  0xfc   : > { %p3834_p4 = pnand %p3832_p12, %p4942_p6  ;;  %p3840_p9 = scmp.lt.s32.totalorder %s3838_s11, %s3831_s27 }
  0xfe   : > { %p3835_p8 = pneg %p3834_p4  ;;  %p3841_p11 = por %p3840_p9, %p3839_p2 }
 0x100   : > { %p3842_p13 = pnand %p3841_p11, %p3835_p8 }
 0x102   : > { %3845 = shalt.err (!%p3842_p13)
}
 0x103   : > { %p4943_p0 = scmp.ne.s32.totalorder %s4924_s28, 0  ;;  %s4944_s8 = smov 4  }
 0x104   : > { %s4945_s16 = smov 64   ;;  %p4946_p6 = scmp.ne.s32.totalorder %s4922_s17, 0 }
 0x105   : > { %3413 = dma.hbm_to_vmem [thread:$0]  (!%p4943_p0), %s4323_s14, 2048, %s4327_s13, %s4137_s9, %s4945_s16, %s4945_s16, %s4944_s8  }
 0x106   : > { %654 = sbr.rel (%p4946_p6) target bundleno = 4940 (0x134c), region = 84  ;;  %p4947_p7 = scmp.eq.s32.totalorder (!%p4946_p6), %s4049_s25, 0 }
 0x10d   : > { %3889 = dma.done.wait (%p4947_p7), [#allocation4], 256   ;;  %p4948_p5 = pmov %p4947_p7 }
 0x10f   : > { %3891 = vsyncadd (%p4948_p5), [#allocation4], 4294967040  ;;  %p4949_p1 = pmov %p4948_p5 }
 0x111   : > { %3893 = dma.done.wait (%p4949_p1), [#allocation7], 32   ;;  %p4950_p3 = pmov %p4949_p1 }
 0x112   : > { %s664_s28 = sand.u32 1, %s4049_s25   ;;  %s4366_s9 = sand.u32 1, %s3910_s22  }
 0x113   : > { %3895 = vsyncadd (%p4950_p3), [#allocation7], 4294967264  ;;  %s665_s17 = scalar_lea.sflag [#allocation4], %s664_s28  ;;  %p4951_p10 = scmp.ne.s32.totalorder %s4921_s0, 0 }
 0x115   : > { %3897 = dma.done.wait (%p4951_p10), %s665_s17, 8224  }
 0x116   : > { %3899 = vsyncadd (%p4951_p10), %s665_s17, 4294959072  ;;  %s3362_s14 = smul.u32 192, %s4366_s9  ;;  %s2998_s15 = sshll.u32 %s4366_s9, 6 }
 0x117   : > { %s2999_s29 = sshll.u32 %s4366_s9, 7  ;;  %p798_p12 = scmp.lt.s32.totalorder %s4049_s25, 1 }
 0x118   : > { %s4952_s18 = sld [smem:[#allocation29_spill]]  ;;  %s4953_s11 = sld [smem:[#allocation30_spill]] }
 0x119   : > { %s4378_s13 = scalar_select %p798_p12, %s4049_s25, 1 }
 0x11a   : > { %s4954_s17 = sld [smem:[#allocation27_spill]]  ;;  %s4955_s6 = sld [smem:[#allocation32_spill]] }
 0x11b   : > { %s3363_s0 = smul.u32 3, %s4378_s13  ;;  %s3001_s1 = sshll.u32 %s4378_s13, 1 }
 0x11c   : > { %s4956_s2 = sld [smem:[#allocation33_spill]]  ;;  %s675_s30 = scalar_lea.vmem [#allocation9], %s4366_s9 }
 0x11d   : > { %s4411_s21 = scalar_lea.vmem [#allocation11], %s2998_s15  ;;  %s4413_s5 = scalar_lea.vmem [#allocation12], %s2999_s29 }
 0x11e   : > { %s807_s27 = scalar_lea.vmem %s4952_s18, %s4378_s13  ;;  %s810_s8 = scalar_lea.vmem %s4953_s11, %s4378_s13 }
 0x11f   : > { %s4409_s18 = scalar_lea.vmem [#allocation10], %s3362_s14  ;;  %s4415_s11 = scalar_lea.vmem [#allocation13], %s2999_s29 }
 0x120   : > { %s4396_s19 = scalar_lea.vmem %s4954_s17, %s3363_s0  ;;  %s4402_s10 = scalar_lea.vmem %s4955_s6, %s3001_s1 }
 0x121   : > { %p4957_p4 = scmp.ne.s32.totalorder %s4049_s25, 0 }
 0x122   : > { %s817_s23 = scalar_lea.vmem %s4956_s2, %s4378_s13  ;;  %v823_v0 = vld [vmem:[#allocation3] sm:$0xff] (!%p4957_p4)  ;;  %v824_v1 = vld [vmem:[#allocation3 + $0x8] sm:$0xff] (!%p4957_p4) }
 0x123   : > { %822 = sbr.rel (%p4957_p4) target bundleno = 298 (0x12a), region = 120  ;;  %825 = vst [vmem:[#allocation2] sm:$0xff] (!%p4957_p4), %v823_v0  ;;  %826 = vst [vmem:[#allocation2 + $0x8] sm:$0xff] (!%p4957_p4), %v824_v1 }
 0x12a PF: > { %v827_v2 = vld [vmem:[#allocation2] sm:$0xff]  ;;  %v828_v3 = vld [vmem:[#allocation2 + $0x8] sm:$0xff]  ;;  %v3936_v15 = vmov 0.0   ;;  %v3937_v29 = vmov 0   ;;  %vm3938_vm0 = vmmov 0   ;;  %s4958_s1 = scalar_lea.vmem [#allocation8], %s4366_s9  ;;  %v920_v1 = vlaneseq  ;;  %s4963_s14 = scalar_lea.vmem %s4870_s7, %s4378_s13 }
 0x12b   : > { %831 = vadd.xlane.f32.xlu0 %v827_v2  ;;  %v3472_v12 = vld [vmem:[%s4409_s18 + $0x4] ss:$12 sps:$4 sm:$0xff]   ;;  %v3474_v13 = vld [vmem:[%s4409_s18] ss:$12 sps:$4 sm:$0xff]   ;;  %v3475_v14 = vld [vmem:[%s4409_s18 + $0x8] ss:$12 sps:$4 sm:$0xff]   ;;  %3188 = vmatprep.subr.bf16.mxu1 %v3936_v15 }
 0x12c   : > { %1063 = vmatprep.subr.bf16.mxu0 %v3472_v12  ;;  %3189 = vmatpush3.bf16.msra.mxu1 %v3475_v14  ;;  %v3476_v16 = vld [vmem:[%s4409_s18 + $0x1c] ss:$12 sps:$4 sm:$0xff]   ;;  %v3478_v17 = vld [vmem:[%s4409_s18 + $0x18] ss:$12 sps:$4 sm:$0xff]   ;;  %v3479_v18 = vld [vmem:[%s4409_s18 + $0x20] ss:$12 sps:$4 sm:$0xff]  }
 0x12d   : > { %1064 = vmatpush1.bf16.msra.mxu0 %v3474_v13  ;;  %3190 = vmatprep.subr.bf16.mxu1 %v3936_v15  ;;  %v3480_v19 = vld [vmem:[%s4409_s18 + $0x34] ss:$12 sps:$4 sm:$0xff]   ;;  %v3482_v20 = vld [vmem:[%s4409_s18 + $0x30] ss:$12 sps:$4 sm:$0xff]   ;;  %v3483_v21 = vld [vmem:[%s4409_s18 + $0x38] ss:$12 sps:$4 sm:$0xff]  }
 0x12e   : > { %1065 = vmatprep.subr.bf16.mxu0 %v3476_v16  ;;  %v3484_v22 = vld [vmem:[%s4409_s18 + $0x4c] ss:$12 sps:$4 sm:$0xff]   ;;  %v3486_v23 = vld [vmem:[%s4409_s18 + $0x48] ss:$12 sps:$4 sm:$0xff]   ;;  %v3487_v24 = vld [vmem:[%s4409_s18 + $0x50] ss:$12 sps:$4 sm:$0xff]   ;;  %1095 = vmatprep.mubr.bf16.mxu0 %v3937_v29 }
 0x12f   : > { %833 = vadd.xlane.f32.xlu0 %v828_v3  ;;  %v3488_v25 = vld [vmem:[%s4409_s18 + $0x64] ss:$12 sps:$4 sm:$0xff]   ;;  %v3490_v26 = vld [vmem:[%s4409_s18 + $0x60] ss:$12 sps:$4 sm:$0xff]   ;;  %v3491_v27 = vld [vmem:[%s4409_s18 + $0x68] ss:$12 sps:$4 sm:$0xff]   ;;  %3204 = vmatprep.mubr.msk.bf16.mxu1 %vm3938_vm0, %v3936_v15 }
 0x130   : > { %3191 = vmatpush3.bf16.msra.mxu1 %v3479_v18  ;;  %v3492_v28 = vld [vmem:[%s4409_s18 + $0x7c] ss:$12 sps:$4 sm:$0xff]   ;;  %v3494_v30 = vld [vmem:[%s4409_s18 + $0x78] ss:$12 sps:$4 sm:$0xff]   ;;  %v3495_v31 = vld [vmem:[%s4409_s18 + $0x80] ss:$12 sps:$4 sm:$0xff]  }
 0x131   : > { %1066 = vmatpush1.bf16.msra.mxu0 %v3478_v17  ;;  %3192 = vmatprep.subr.bf16.mxu1 %v3936_v15  ;;  %v3496_v32 = vld [vmem:[%s4409_s18 + $0x94] ss:$12 sps:$4 sm:$0xff]   ;;  %v3498_v33 = vld [vmem:[%s4409_s18 + $0x90] ss:$12 sps:$4 sm:$0xff]   ;;  %v3499_v34 = vld [vmem:[%s4409_s18 + $0x98] ss:$12 sps:$4 sm:$0xff]  }
 0x132   : > { %1067 = vmatprep.subr.bf16.mxu0 %v3480_v19  ;;  %v3500_v35 = vld [vmem:[%s4409_s18 + $0xac] ss:$12 sps:$4 sm:$0xff]   ;;  %v3502_v36 = vld [vmem:[%s4409_s18 + $0xa8] ss:$12 sps:$4 sm:$0xff]   ;;  %v3503_v37 = vld [vmem:[%s4409_s18 + $0xb0] ss:$12 sps:$4 sm:$0xff]  }
 0x133   : > { %v3003_v54 = vld [vmem:[%s4958_s1] ss:$0 sm:$0xff]  ;;  %vm1206_vm5 = vcmask 261120   ;;  %vm1269_vm6 = vcmask 1043456   ;;  %vm1252_vm9 = vcmask 64512   ;;  %s3939_s3 = smov 96  }
 0x134   : > { %3193 = vmatpush3.bf16.msra.mxu1 %v3483_v21  ;;  %v3004_v60 = vld [vmem:[%s675_s30] ss:$0 sm:$0xff]  ;;  %s3940_s4 = smov 64   ;;  %s3941_s6 = smov 32   ;;  %vm1655_vm12 = vcmask 523264   ;;  %vm1657_vm13 = vcmask 785408  }
 0x135   : > { %1068 = vmatpush1.bf16.msra.mxu0 %v3482_v20  ;;  %3194 = vmatprep.subr.bf16.mxu1 %v3936_v15  ;;  %p3089_p8 = scmp.ne.s32.totalorder %s4049_s25, 1 }
 0x136   : > { %1069 = vmatprep.subr.bf16.mxu0 %v3484_v22  ;;  %s4967_s20 = sld [smem:[#allocation34_spill]] (!%p3089_p8)  ;;  %s4968_s30 = sld [smem:[#allocation35_spill]] (!%p3089_p8) }
 0x138   : > { %3195 = vmatpush3.bf16.msra.mxu1 %v3487_v24 }
 0x139   : > { %1070 = vmatpush1.bf16.msra.mxu0 %v3486_v23  ;;  %3196 = vmatprep.subr.bf16.mxu1 %v3936_v15 }
 0x13a   : > { %1071 = vmatprep.subr.bf16.mxu0 %v3488_v25 }
 0x13c   : > { %3197 = vmatpush3.bf16.msra.mxu1 %v3491_v27 }
 0x13d   : > { %1072 = vmatpush1.bf16.msra.mxu0 %v3490_v26  ;;  %3198 = vmatprep.subr.bf16.mxu1 %v3936_v15 }
 0x13e   : > { %1073 = vmatprep.subr.bf16.mxu0 %v3492_v28 }
 0x140   : > { %3199 = vmatpush3.bf16.msra.mxu1 %v3495_v31 }
 0x141   : > { %1074 = vmatpush1.bf16.msra.mxu0 %v3494_v30  ;;  %3200 = vmatprep.subr.bf16.mxu1 %v3936_v15 }
 0x142   : > { %1075 = vmatprep.subr.bf16.mxu0 %v3496_v32 }
 0x144   : > { %3201 = vmatpush3.bf16.msra.mxu1 %v3499_v34 }
 0x145   : > { %1076 = vmatpush1.bf16.msra.mxu0 %v3498_v33  ;;  %3202 = vmatprep.subr.bf16.mxu1 %v3936_v15 }
 0x146   : > { %1077 = vmatprep.subr.bf16.mxu0 %v3500_v35  ;;  %v1147_v35 = vld [vmem:[#allocation6] sm:$0x1] }
 0x147   : > { %vm1148_vm7 = vcmp.eq.s32.totalorder %v1147_v35, 0 }
 0x148   : > { %3203 = vmatpush3.bf16.msra.mxu1 %v3503_v37 }
 0x149   : > { %1078 = vmatpush1.bf16.msra.mxu0 %v3502_v36  ;;  %3208 = vmatprep.subr.bf16.mxu1 %v3936_v15  ;;  %v1149_v36 = vsel %vm1148_vm7, 1, %v3937_v29 }
 0x14a   : > { %3236 = vmatprep.subr.bf16.mxu0 %v3936_v15 }
 0x1b8   : > { %v832_v4 = vpop.xlane.xlu0 %831 }
 0x1b9   : > { %v836_v5 = vmul.f32 0.0078125, %v832_v4  ;;  %v918_v4 = vld [vmem:[%s4396_s19] sm:$0x7] }
 0x1bb   : > { %v4419_v6 = vsub.f32 %v827_v2, %v836_v5  ;;  %v4474_v2 = vshrl.u32 %v920_v1, 7 }
 0x1bc   : > { %v834_v7 = vpop.xlane.xlu0 %833 }
 0x1bd   : > { %v837_v8 = vmul.f32 0.0078125, %v834_v7  ;;  %v840_v9 = vmul.f32 %v4419_v6, %v4419_v6  ;;  %v869_v56 = vmul.f32 %v3003_v54, %v4419_v6  ;;  %v4479_v5 = vsub.s32 0, %v4474_v2 }
 0x1be   : > { %v930_v6 = vsub.s32 2, %v4474_v2 }
 0x1bf   : > { %v4423_v10 = vsub.f32 %v828_v3, %v837_v8  ;;  %842 = vadd.xlane.f32.xlu1 %v840_v9  ;;  %v926_v3 = vsub.s32 1, %v4474_v2  ;;  %v1153_v37 = vrot.slane %v1149_v36, %v4479_v5 }
 0x1c1   : > { %v841_v11 = vmul.f32 %v4423_v10, %v4423_v10  ;;  %v870_v57 = vmul.f32 %v3003_v54, %v4423_v10  ;;  %v927_v7 = vrot.slane %v918_v4, %v926_v3  ;;  %v923_v10 = vrot.slane %v918_v4, %v4479_v5 }
 0x1c2   : > { %vm4503_vm8 = vcmp.eq.s32.totalorder %v1153_v37, 1 }
 0x1c3   : > { %844 = vadd.xlane.f32.xlu1 %v841_v11  ;;  %v931_v11 = vrot.slane %v918_v4, %v930_v6 }
 0x24c   : > { %v843_v38 = vpop.xlane.xlu1 %842 }
 0x24d   : > { %v847_v39 = vmul.f32 0.007874016, %v843_v38 }
 0x24f   : > { %3552 = vrsqrt.f32 %v847_v39  ;;  %vm851_vm1 = vcmp.eq.f32.partialorder %v847_v39, inf  ;;  %v854_v44 = vand.u32 2147483648, %v847_v39  ;;  %vm853_vm2 = vcmp.eq.f32.partialorder %v847_v39, 0.0 }
 0x250   : > { %v845_v40 = vpop.xlane.xlu1 %844 }
 0x251   : > { %v848_v41 = vmul.f32 0.007874016, %v845_v40 }
 0x253   : > { %3554 = vrsqrt.f32 %v848_v41  ;;  %vm858_vm3 = vcmp.eq.f32.partialorder %v848_v41, inf  ;;  %v861_v50 = vand.u32 2147483648, %v848_v41  ;;  %vm860_vm4 = vcmp.eq.f32.partialorder %v848_v41, 0.0 }
 0x259   : > { %v3553_v42 = vpop.eup %3552 }
 0x25a   : > { %v850_v43 = vmul.f32 %v3553_v42, %v847_v39 }
 0x25c   : > { %v852_v45 = vsel %vm851_vm1, %v847_v39, %v850_v43 }
 0x25d   : > { %v3555_v46 = vpop.eup %3554  ;;  %v855_v47 = vsel %vm853_vm2, %v854_v44, %v852_v45 }
 0x25e   : > { %v857_v48 = vmul.f32 %v3555_v46, %v848_v41  ;;  %v871_v49 = vadd.f32 1e-06, %v855_v47 }
 0x260   : > { %v859_v51 = vsel %vm858_vm3, %v848_v41, %v857_v48  ;;  %3556 = vrcp.f32 %v871_v49 }
 0x261   : > { %v862_v52 = vsel %vm860_vm4, %v861_v50, %v859_v51 }
 0x262   : > { %v872_v53 = vadd.f32 1e-06, %v862_v52 }
 0x264   : > { %3558 = vrcp.f32 %v872_v53 }
 0x26a   : > { %v3557_v55 = vpop.eup %3556 }
 0x26b   : > { %v874_v58 = vmul.f32 %v3557_v55, %v869_v56 }
 0x26d   : > { %v883_v62 = vadd.f32 %v3004_v60, %v874_v58 }
 0x26e   : > { %v3559_v59 = vpop.eup %3558 }
 0x26f   : > { %v876_v61 = vmul.f32 %v3559_v59, %v870_v57 }
 0x271   : > { %v884_v63 = vadd.f32 %v3004_v60, %v876_v61 }
 0x273   : > { %v885_v0 = vpack.c.bf16 %v884_v63, %v883_v62 }
 0x275   : > { %1096 = vmatmul.mubr.bf16.vlgmr.msra.gmra.mrb[0].mxu0 %v885_v0  ;;  %3205 = vmatmul.mubr.bf16.vlgmr.msra.gmra.mrb[0].mxu1 %v885_v0 }
 0x276   : > { %3212 = vmatprep.mubr.msk.bf16.mxu1 %vm3938_vm0, %v3936_v15  ;;  %3240 = vmatprep.mubr.msk.bf16.mxu0 %vm3938_vm0, %v3936_v15 }
 0x348   : > { %v1097_v8 = vpop.f32.mrb[0].mxu0  ;;  %v1140_v9 = vpop.f32.mrb[0].mxu1 }
 0x349   : > { %v1099_v12 = vpop.f32.mrb[1].mxu0  ;;  %v3206_v13 = vpop.f32.mrb[1].mxu1  ;;  %v1141_v27 = vadd.f32 %v1140_v9, %v931_v11  ;;  %v1098_v28 = vadd.f32 %v1097_v8, %v923_v10 }
 0x34a   : > { %v1100_v14 = vadd.f32 %v1099_v12, %v927_v7  ;;  %v1101_v16 = vpop.f32.mrb[2].mxu0  ;;  %v1143_v17 = vpop.f32.mrb[2].mxu1 }
 0x34b   : > { %v4485_v18 = vadd.f32 %v1101_v16, %v923_v10  ;;  %v4487_v19 = vadd.f32 %v1143_v17, %v931_v11  ;;  %v1103_v20 = vpop.f32.mrb[3].mxu0  ;;  %v3207_v21 = vpop.f32.mrb[3].mxu1  ;;  %v4492_v32 = vpack.c.bf16 %v1141_v27, %v1141_v27  ;;  %v1203_v33 = vpack.c.bf16 %v1098_v28, %v1098_v28 }
 0x34c   : > { %v4489_v22 = vadd.f32 %v1103_v20, %v927_v7  ;;  %1171 = vxpose.xlu0.b32.start.end [1/1] (short) %v1100_v14, 128 }
 0x34d   : > { %v1271_v34 = vsel %vm1269_vm6, %v4492_v32, 0 }
 0x3cc   : > { %v1187_v23 = vpop.trf.xlu0 }
 0x3d0   : > { %v1188_v24 = vpop.trf.xlu0 }
 0x3d1   : > { %v1204_v25 = vpack.c.bf16 %v1188_v24, %v1187_v23 }
 0x3d3   : > { %3209 = vmatpush3.bf16.msra.mxu1 %v1204_v25 }
 0x3d4   : > { %v1189_v26 = vpop.trf.xlu0  ;;  %3210 = vmatprep.subr.bf16.mxu1 %v3936_v15 }
 0x3d8   : > { %v1190_v30 = vpop.trf.xlu0 }
 0x3d9   : > { %v1205_v31 = vpack.c.bf16 %v1190_v30, %v1189_v26 }
 0x3db   : > { %3211 = vmatpush3.bf16.msra.mxu1 %v1205_v31 }
 0x3dc   : > { %3216 = vmatprep.subr.bf16.mxu1 %v3936_v15  ;;  %v1191_v46 = vpop.trf.xlu0 }
 0x3de   : > { %3213 = vmatmul.mubr.msk.bf16.vlgmr.msra.gmra.mrb[4].mxu1 %vm1206_vm5, %v1203_v33 }
 0x3df   : > { %3217 = vmatpush3.bf16.msra.mxu1 %v1271_v34  ;;  %3218 = vmatprep.mubr.msk.bf16.mxu1 %vm3938_vm0, %v3936_v15 }
 0x3e0   : > { %3222 = vmatprep.subr.bf16.mxu1 %v3936_v15  ;;  %v1192_v47 = vpop.trf.xlu0 }
 0x3e1   : > { %v1313_v48 = vpack.c.bf16 %v1192_v47, %v1191_v46 }
 0x3e4   : > { %v1193_v49 = vpop.trf.xlu0 }
 0x3e8   : > { %v1194_v50 = vpop.trf.xlu0 }
 0x3e9   : > { %v1314_v51 = vpack.c.bf16 %v1194_v50, %v1193_v49 }
 0x3ec   : > { %v1195_v52 = vpop.trf.xlu0 }
 0x3f0   : > { %v1196_v53 = vpop.trf.xlu0 }
 0x3f1   : > { %v1424_v54 = vpack.c.bf16 %v1196_v53, %v1195_v52 }
 0x3f3   : > { %3237 = vmatpush3.bf16.msra.mxu0 %v1424_v54 }
 0x3f4   : > { %v1197_v55 = vpop.trf.xlu0  ;;  %3238 = vmatprep.subr.bf16.mxu0 %v3936_v15 }
 0x3f8   : > { %v1198_v56 = vpop.trf.xlu0 }
 0x3f9   : > { %v1425_v57 = vpack.c.bf16 %v1198_v56, %v1197_v55 }
 0x3fb   : > { %3239 = vmatpush3.bf16.msra.mxu0 %v1425_v57 }
 0x3fc   : > { %3250 = vmatprep.subr.bf16.mxu0 %v3936_v15  ;;  %v1199_v63 = vpop.trf.xlu0 }
 0x400   : > { %v1200_v0 = vpop.trf.xlu0 }
 0x401   : > { %v1533_v7 = vpack.c.bf16 %v1200_v0, %v1199_v63 }
 0x404   : > { %v1201_v4 = vpop.trf.xlu0 }
 0x408   : > { %v1202_v8 = vpop.trf.xlu0 }
 0x409   : > { %v1534_v10 = vpack.c.bf16 %v1202_v8, %v1201_v4 }
 0x4b1   : > { %v1244_v38 = vpop.f32.mrb[4].mxu1 }
 0x4b2   : > { %v1250_v40 = vmul.f32 0.17677669, %v1244_v38  ;;  %v3214_v41 = vpop.f32.mrb[5].mxu1 }
 0x4b3   : > { %v1247_v42 = vpop.f32.mrb[6].mxu1 }
 0x4b4   : > { %v3215_v43 = vpop.f32.mrb[7].mxu1  ;;  %v1251_v44 = vsel %vm4503_vm8, -1e+09, %v1250_v40 }
 0x4b5   : > { %v1253_v45 = vsel %vm1252_vm9, %v1251_v44, -inf }
 0x4b6   : > { %1254 = vmax.xlane.f32.xlu1 %v1253_v45 }
 0x543   : > { %v1255_v58 = vpop.xlane.xlu1 %1254 }
 0x544   : > { %v1256_v59 = vsub.f32 %v1251_v44, %v1255_v58 }
 0x546   : > { %v1257_v60 = vmul.f32 1.442695, %v1256_v59 }
 0x548   : > { %3560 = vpow2.f32 %v1257_v60 }
 0x552   : > { %v3561_v61 = vpop.eup %3560 }
 0x553   : > { %v1259_v62 = vsel %vm1252_vm9, %v3561_v61, 0.0 }
 0x554   : > { %1260 = vadd.xlane.f32.xlu1 %v1259_v62 }
 0x565   : > { %1316 = vrot.lane.b32.xlu1 %v1203_v33, %s3939_s3 }
 0x569   : > { %1426 = vrot.lane.b32.xlu1 %v1203_v33, %s3940_s4 }
 0x56d   : > { %1535 = vrot.lane.b32.xlu1 %v1203_v33, %s3941_s6 }
 0x5e1   : > { %v1261_v1 = vpop.xlane.xlu1 %1260 }
 0x5e2   : > { %3562 = vrcp.f32 %v1261_v1 }
 0x5e5   : > { %v1317_v6 = vpop.permute.xlu1 %1316 }
 0x5e9   : > { %v1427_v9 = vpop.permute.xlu1 %1426 }
 0x5ea   : > { %3241 = vmatmul.mubr.msk.bf16.vlgmr.msra.gmra.mrb[4].mxu0 %vm1206_vm5, %v1427_v9 }
 0x5eb   : > { %3251 = vmatpush3.bf16.msra.mxu0 %v1533_v7  ;;  %3254 = vmatprep.mubr.msk.bf16.mxu0 %vm3938_vm0, %v3936_v15 }
 0x5ec   : > { %v3563_v11 = vpop.eup %3562  ;;  %3252 = vmatprep.subr.bf16.mxu0 %v3936_v15 }
 0x5ed   : > { %v1263_v12 = vmul.f32 %v3563_v11, %v3561_v61  ;;  %v1536_v14 = vpop.permute.xlu1 %1535 }
 0x5ef   : > { %3253 = vmatpush3.bf16.msra.mxu0 %v1534_v10  ;;  %v1264_v13 = vpack.c.bf16 %v1263_v12, %v1263_v12 }
 0x5f0   : > { %3264 = vmatprep.subr.bf16.mxu0 %v3936_v15 }
 0x5f1   : > { %3219 = vmatmul.mubr.msk.bf16.vlgmr.msra.gmra.mrb[8].mxu1 %vm1252_vm9, %v1264_v13 }
 0x5f2   : > { %3223 = vmatpush3.bf16.msra.mxu1 %v1313_v48  ;;  %3255 = vmatmul.mubr.msk.bf16.vlgmr.msra.gmra.mrb[8].mxu0 %vm1206_vm5, %v1536_v14 }
 0x5f3   : > { %3224 = vmatprep.subr.bf16.mxu1 %v3936_v15  ;;  %3226 = vmatprep.mubr.msk.bf16.mxu1 %vm3938_vm0, %v3936_v15 }
 0x5f4   : > { %3280 = vmatprep.mubr.msk.bf16.mxu0 %vm3938_vm0, %v3936_v15 }
 0x5f6   : > { %3225 = vmatpush3.bf16.msra.mxu1 %v1314_v51 }
 0x5f7   : > { %3230 = vmatprep.subr.bf16.mxu1 %v3936_v15 }
 0x5f9   : > { %3227 = vmatmul.mubr.msk.bf16.vlgmr.msra.gmra.mrb[12].mxu1 %vm1206_vm5, %v1317_v6 }
 0x5fa   : > { %3232 = vmatprep.mubr.msk.bf16.mxu1 %vm3938_vm0, %v3936_v15 }
 0x6bd   : > { %v1465_v16 = vpop.f32.mrb[4].mxu0 }
 0x6be   : > { %v1471_v17 = vmul.f32 0.17677669, %v1465_v16  ;;  %v3242_v20 = vpop.f32.mrb[5].mxu0 }
 0x6bf   : > { %v1468_v21 = vpop.f32.mrb[6].mxu0 }
 0x6c0   : > { %v3243_v23 = vpop.f32.mrb[7].mxu0  ;;  %v1472_v24 = vsel %vm4503_vm8, -1e+09, %v1471_v17 }
 0x6c1   : > { %v1473_v25 = vsel %vm1252_vm9, %v1472_v24, -inf }
 0x6c2   : > { %1474 = vmax.xlane.f32.xlu0 %v1473_v25 }
 0x6c4   : > { %v4535_v26 = vpop.f32.mrb[8].mxu1 }
 0x6c5   : > { %v3220_v27 = vpop.f32.mrb[9].mxu1  ;;  %v1574_v28 = vpop.f32.mrb[8].mxu0 }
 0x6c6   : > { %v1310_v30 = vpop.f32.mrb[10].mxu1  ;;  %v3256_v31 = vpop.f32.mrb[9].mxu0  ;;  %v1580_v37 = vmul.f32 0.17677669, %v1574_v28  ;;  %v4571_v27 = vpack.c.bf16 %v4487_v19, %v4487_v19  ;;  %v4575_v28 = vpack.c.bf16 %v4485_v18, %v4485_v18  ;;  %v4592_v18 = vld [vmem:[%s4411_s21 + $0x8] sm:$0xff]  }
 0x6c7   : > { %v3221_v33 = vpop.f32.mrb[11].mxu1  ;;  %v1577_v34 = vpop.f32.mrb[10].mxu0  ;;  %v4588_v31 = vld [vmem:[%s4411_s21] sm:$0xff]  }
 0x6c8   : > { %v3257_v35 = vpop.f32.mrb[11].mxu0  ;;  %v1581_v45 = vsel %vm4503_vm8, -1e+09, %v1580_v37  ;;  %v1854_v30 = vsel %vm1269_vm6, %v4571_v27, 0  ;;  %3265 = vmatpush3.bf16.msra.mxu0 %v4588_v31  ;;  %v4608_v37 = vld [vmem:[%s4411_s21 + $0x18] sm:$0xff]  }
 0x6c9   : > { %v1582_v46 = vsel %vm1252_vm9, %v1581_v45, -inf  ;;  %3266 = vmatprep.subr.bf16.mxu0 %v3936_v15  ;;  %v4601_v35 = vld [vmem:[%s4411_s21 + $0x10] sm:$0xff]  }
 0x6cc   : > { %v1355_v36 = vpop.f32.mrb[12].mxu1  ;;  %3267 = vmatpush3.bf16.msra.mxu0 %v4592_v18 }
 0x6cd   : > { %v1361_v38 = vmul.f32 0.17677669, %v1355_v36  ;;  %v3228_v40 = vpop.f32.mrb[13].mxu1  ;;  %3268 = vmatprep.subr.bf16.mxu0 %v3936_v15 }
 0x6ce   : > { %v1358_v41 = vpop.f32.mrb[14].mxu1 }
 0x6cf   : > { %v3229_v42 = vpop.f32.mrb[15].mxu1  ;;  %v1362_v43 = vsel %vm4503_vm8, -1e+09, %v1361_v38 }
 0x6d0   : > { %v1363_v44 = vsel %vm1252_vm9, %v1362_v43, -inf  ;;  %3269 = vmatpush3.bf16.msra.mxu0 %v4601_v35 }
 0x6d1   : > { %1364 = vmax.xlane.f32.xlu1 %v1363_v44  ;;  %3270 = vmatprep.subr.bf16.mxu0 %v3936_v15 }
 0x6d4   : > { %3271 = vmatpush3.bf16.msra.mxu0 %v4608_v37 }
 0x6d5   : > { %1583 = vmax.xlane.f32.xlu1 %v1582_v46  ;;  %3272 = vmatprep.subr.bf16.mxu0 %v3936_v15 }
 0x74f   : > { %v1475_v47 = vpop.xlane.xlu0 %1474 }
 0x750   : > { %v1476_v48 = vsub.f32 %v1472_v24, %v1475_v47 }
 0x752   : > { %v1477_v49 = vmul.f32 1.442695, %v1476_v48 }
 0x754   : > { %3564 = vpow2.f32 %v1477_v49 }
 0x75e   : > { %v3565_v50 = vpop.eup %3564  ;;  %v1365_v51 = vpop.xlane.xlu1 %1364 }
 0x75f   : > { %v1479_v52 = vsel %vm1252_vm9, %v3565_v50, 0.0  ;;  %v1366_v57 = vsub.f32 %v1362_v43, %v1365_v51 }
 0x760   : > { %1480 = vadd.xlane.f32.xlu1 %v1479_v52 }
 0x761   : > { %v1367_v58 = vmul.f32 1.442695, %v1366_v57 }
 0x762   : > { %v1584_v53 = vpop.xlane.xlu1 %1583 }
 0x763   : > { %v1585_v54 = vsub.f32 %v1581_v45, %v1584_v53  ;;  %v1749_v53 = vld [vmem:[#allocation6 + $0x1] sm:$0x1] }
 0x764   : > { %vm1750_vm10 = vcmp.eq.s32.totalorder %v1749_v53, 0 }
 0x765   : > { %v1586_v55 = vmul.f32 1.442695, %v1585_v54  ;;  %v1751_v54 = vsel %vm1750_vm10, 1, %v3937_v29 }
 0x767   : > { %3566 = vpow2.f32 %v1586_v55  ;;  %v1755_v55 = vrot.slane %v1751_v54, %v4479_v5 }
 0x768   : > { %3568 = vpow2.f32 %v1367_v58 }
 0x769   : > { %vm4619_vm11 = vcmp.eq.s32.totalorder %v1755_v55, 1 }
 0x771   : > { %v3567_v56 = vpop.eup %3566 }
 0x772   : > { %v1588_v39 = vsel %vm1252_vm9, %v3567_v56, 0.0  ;;  %v3569_v59 = vpop.eup %3568 }
 0x773   : > { %1589 = vadd.xlane.f32.xlu1 %v1588_v39  ;;  %v1369_v60 = vsel %vm1252_vm9, %v3569_v59, 0.0 }
 0x784   : > { %1376 = vrot.lane.b32.xlu1 %v4492_v32, %s3939_s3 }
 0x788   : > { %1485 = vrot.lane.b32.xlu1 %v4492_v32, %s3940_s4 }
 0x7ac   : > { %1370 = vadd.xlane.f32.xlu1 %v1369_v60 }
 0x7bd   : > { %1594 = vrot.lane.b32.xlu1 %v4492_v32, %s3941_s6 }
 0x7e6   : > { %1757 = vxpose.xlu1.b32.start.end [1/1] (short) %v4489_v22, 128 }
 0x7ed   : > { %v1481_v61 = vpop.xlane.xlu1 %1480 }
 0x800   : > { %v1590_v62 = vpop.xlane.xlu1 %1589 }
 0x804   : > { %v1377_v63 = vpop.permute.xlu1 %1376 }
 0x805   : > { %v1382_v0 = vsel %vm1269_vm6, %v1377_v63, 0  ;;  %v4627_v63 = vld [vmem:[%s4411_s21 + $0x20] sm:$0xff]  }
 0x806   : > { %3231 = vmatpush3.bf16.msra.mxu1 %v1382_v0  ;;  %3273 = vmatpush3.bf16.msra.mxu0 %v4627_v63  ;;  %v4632_v0 = vld [vmem:[%s4411_s21 + $0x28] sm:$0xff]  }
 0x807   : > { %3244 = vmatprep.subr.bf16.mxu1 %v3936_v15  ;;  %3274 = vmatprep.subr.bf16.mxu0 %v3936_v15 }
 0x808   : > { %v1486_v1 = vpop.permute.xlu1 %1485 }
 0x809   : > { %v1491_v32 = vsel %vm1269_vm6, %v1486_v1, 0  ;;  %v4637_v1 = vld [vmem:[%s4411_s21 + $0x30] sm:$0xff]  }
 0x80a   : > { %3275 = vmatpush3.bf16.msra.mxu0 %v4632_v0 }
 0x80b   : > { %3276 = vmatprep.subr.bf16.mxu0 %v3936_v15 }
 0x80e   : > { %3277 = vmatpush3.bf16.msra.mxu0 %v4637_v1 }
 0x80f   : > { %3278 = vmatprep.subr.bf16.mxu0 %v3936_v15 }
 0x839   : > { %v1371_v4 = vpop.xlane.xlu1 %1370 }
 0x83a   : > { %3570 = vrcp.f32 %v1371_v4  ;;  %v4643_v4 = vld [vmem:[%s4411_s21 + $0x38] sm:$0xff]  }
 0x83b   : > { %3572 = vrcp.f32 %v1481_v61  ;;  %3279 = vmatpush3.bf16.msra.mxu0 %v4643_v4 }
 0x83c   : > { %3574 = vrcp.f32 %v1590_v62  ;;  %3312 = vmatprep.subr.bf16.mxu0 %v3936_v15 }
 0x83d   : > { %v1595_v10 = vpop.permute.xlu1 %1594 }
 0x83e   : > { %v1600_v13 = vsel %vm1269_vm6, %v1595_v10, 0 }
 0x844   : > { %v3571_v6 = vpop.eup %3570 }
 0x845   : > { %v1373_v7 = vmul.f32 %v3571_v6, %v3569_v59  ;;  %v3573_v9 = vpop.eup %3572 }
 0x846   : > { %v1483_v22 = vmul.f32 %v3573_v9, %v3565_v50  ;;  %v3575_v12 = vpop.eup %3574 }
 0x847   : > { %v1374_v8 = vpack.c.bf16 %v1373_v7, %v1373_v7  ;;  %v1592_v14 = vmul.f32 %v3575_v12, %v3567_v56 }
 0x848   : > { %v1484_v11 = vpack.c.bf16 %v1483_v22, %v1483_v22 }
 0x849   : > { %3233 = vmatmul.mubr.msk.bf16.vlgmr.msra.gmra.mrb[16].mxu1 %vm1252_vm9, %v1374_v8  ;;  %v1593_v16 = vpack.c.bf16 %v1592_v14, %v1592_v14 }
 0x84a   : > { %3245 = vmatpush3.bf16.msra.mxu1 %v1491_v32  ;;  %3246 = vmatprep.mubr.msk.bf16.mxu1 %vm3938_vm0, %v3936_v15 }
 0x84b   : > { %3258 = vmatprep.subr.bf16.mxu1 %v3936_v15 }
 0x851   : > { %3247 = vmatmul.mubr.msk.bf16.vlgmr.msra.gmra.mrb[20].mxu1 %vm1252_vm9, %v1484_v11 }
 0x852   : > { %3259 = vmatpush3.bf16.msra.mxu1 %v1600_v13  ;;  %3260 = vmatprep.mubr.msk.bf16.mxu1 %vm3938_vm0, %v3936_v15 }
 0x853   : > { %3284 = vmatprep.subr.bf16.mxu1 %v3936_v15 }
 0x859   : > { %3261 = vmatmul.mubr.msk.bf16.vlgmr.msra.gmra.mrb[24].mxu1 %vm1252_vm9, %v1593_v16 }
 0x85a   : > { %3288 = vmatprep.mubr.msk.bf16.mxu1 %vm3938_vm0, %v3936_v15 }
 0x866   : > { %v1773_v17 = vpop.trf.xlu1 }
 0x86a   : > { %v1774_v20 = vpop.trf.xlu1 }
 0x86b   : > { %v1790_v21 = vpack.c.bf16 %v1774_v20, %v1773_v17 }
 0x86d   : > { %3285 = vmatpush3.bf16.msra.mxu1 %v1790_v21 }
 0x86e   : > { %v1775_v23 = vpop.trf.xlu1  ;;  %3286 = vmatprep.subr.bf16.mxu1 %v3936_v15 }
 0x872   : > { %v1776_v24 = vpop.trf.xlu1 }
 0x873   : > { %v1791_v25 = vpack.c.bf16 %v1776_v24, %v1775_v23 }
 0x875   : > { %3287 = vmatpush3.bf16.msra.mxu1 %v1791_v25 }
 0x876   : > { %3292 = vmatprep.subr.bf16.mxu1 %v3936_v15  ;;  %v4585_v19 = vpop.trf.xlu1 }
 0x878   : > { %3289 = vmatmul.mubr.msk.bf16.vlgmr.msra.gmra.mrb[28].mxu1 %vm1206_vm5, %v4575_v28 }
 0x879   : > { %3293 = vmatpush3.bf16.msra.mxu1 %v1854_v30  ;;  %3294 = vmatprep.mubr.msk.bf16.mxu1 %vm3938_vm0, %v3936_v15 }
 0x87a   : > { %3298 = vmatprep.subr.bf16.mxu1 %v3936_v15  ;;  %v4595_v33 = vpop.trf.xlu1 }
 0x87b   : > { %v1896_v34 = vpack.c.bf16 %v4595_v33, %v4585_v19 }
 0x87e   : > { %v4604_v36 = vpop.trf.xlu1 }
 0x882   : > { %v4611_v38 = vpop.trf.xlu1 }
 0x883   : > { %v1897_v40 = vpack.c.bf16 %v4611_v38, %v4604_v36 }
 0x886   : > { %v1781_v6 = vpop.trf.xlu1 }
 0x88a   : > { %v1782_v7 = vpop.trf.xlu1 }
 0x88b   : > { %v2007_v21 = vpack.c.bf16 %v1782_v7, %v1781_v6 }
 0x88e   : > { %v1783_v8 = vpop.trf.xlu1 }
 0x892   : > { %v1784_v9 = vpop.trf.xlu1 }
 0x896   : > { %v1785_v12 = vpop.trf.xlu1 }
 0x89a   : > { %v1786_v14 = vpop.trf.xlu1 }
 0x89e   : > { %v1787_v30 = vpop.trf.xlu1 }
 0x91c   : > { %v1418_v41 = vpop.f32.mrb[16].mxu1 }
 0x91d   : > { %v3234_v42 = vpop.f32.mrb[17].mxu1 }
 0x91e   : > { %v1421_v43 = vpop.f32.mrb[18].mxu1 }
 0x91f   : > { %v3235_v44 = vpop.f32.mrb[19].mxu1  ;;  %v1788_v43 = vpop.trf.xlu1 }
 0x924   : > { %v1527_v45 = vpop.f32.mrb[20].mxu1 }
 0x925   : > { %v3248_v46 = vpop.f32.mrb[21].mxu1 }
 0x926   : > { %v1530_v47 = vpop.f32.mrb[22].mxu1 }
 0x927   : > { %v3249_v48 = vpop.f32.mrb[23].mxu1 }
 0x92c   : > { %v1636_v49 = vpop.f32.mrb[24].mxu1 }
 0x92d   : > { %v3262_v50 = vpop.f32.mrb[25].mxu1 }
 0x92e   : > { %v1639_v51 = vpop.f32.mrb[26].mxu1 }
 0x92f   : > { %v3263_v52 = vpop.f32.mrb[27].mxu1 }
 0x94b   : > { %v1829_v56 = vpop.f32.mrb[28].mxu1 }
 0x94c   : > { %v1835_v57 = vmul.f32 0.17677669, %v1829_v56  ;;  %v3290_v58 = vpop.f32.mrb[29].mxu1 }
 0x94d   : > { %v1832_v59 = vpop.f32.mrb[30].mxu1 }
 0x94e   : > { %v3291_v60 = vpop.f32.mrb[31].mxu1  ;;  %v1836_v61 = vsel %vm4619_vm11, -1e+09, %v1835_v57 }
 0x94f   : > { %v1837_v62 = vsel %vm1252_vm9, %v1836_v61, -inf }
 0x950   : > { %1838 = vmax.xlane.f32.xlu0 %v1837_v62 }
 0x966   : > { %1643 = vrot.lane.b32.xlu0 %v1418_v41, %s3941_s6  ;;  %v2008_v41 = vpack.c.bf16 %v1784_v9, %v1783_v8 }
 0x96a   : > { %1647 = vrot.lane.b32.xlu0 %v1527_v45, %s3940_s4  ;;  %v2117_v45 = vpack.c.bf16 %v1788_v43, %v1787_v30 }
 0x96e   : > { %1651 = vrot.lane.b32.xlu0 %v1636_v49, %s3939_s3 }
 0x972   : > { %1899 = vrot.lane.b32.xlu0 %v4575_v28, %s3939_s3 }
 0x976   : > { %2009 = vrot.lane.b32.xlu0 %v4575_v28, %s3940_s4 }
 0x97a   : > { %2118 = vrot.lane.b32.xlu0 %v4575_v28, %s3941_s6 }
 0x9dd   : > { %v1839_v32 = vpop.xlane.xlu0 %1838 }
 0x9de   : > { %v1840_v22 = vsub.f32 %v1836_v61, %v1839_v32 }
 0x9e0   : > { %v1841_v10 = vmul.f32 1.442695, %v1840_v22 }
 0x9e1   : > { %v1644_v11 = vpop.permute.xlu0 %1643 }
 0x9e2   : > { %3576 = vpow2.f32 %v1841_v10  ;;  %v1654_v16 = vsel %vm1206_vm5, %v4535_v26, %v1644_v11  ;;  %v2116_v26 = vpack.c.bf16 %v1786_v14, %v1785_v12 }
 0x9e5   : > { %v1648_v13 = vpop.permute.xlu0 %1647 }
 0x9e6   : > { %v1656_v17 = vsel %vm1655_vm12, %v1654_v16, %v1648_v13 }
 0x9e9   : > { %v1652_v20 = vpop.permute.xlu0 %1651 }
 0x9ea   : > { %v1658_v23 = vsel %vm1657_vm13, %v1656_v17, %v1652_v20 }
 0x9eb   : > { %v1659_v24 = vpack.c.bf16 %v1658_v23, %v1658_v23 }
 0x9ec   : > { %v3577_v25 = vpop.eup %3576 }
 0x9ed   : > { %3281 = vmatmul.mubr.bf16.vlgmr.msra.gmra.mrb[12].mxu0 %v1659_v24  ;;  %v1843_v28 = vsel %vm1252_vm9, %v3577_v25, 0.0  ;;  %v1900_v42 = vpop.permute.xlu0 %1899 }
 0x9ee   : > { %1844 = vadd.xlane.f32.xlu1 %v1843_v28  ;;  %3313 = vmatpush3.bf16.msra.mxu0 %v2007_v21 }
 0x9ef   : > { %3314 = vmatprep.subr.bf16.mxu0 %v3936_v15  ;;  %3316 = vmatprep.mubr.msk.bf16.mxu0 %vm3938_vm0, %v3936_v15 }
 0x9f1   : > { %v2010_v44 = vpop.permute.xlu0 %2009 }
 0x9f2   : > { %3315 = vmatpush3.bf16.msra.mxu0 %v2008_v41 }
 0x9f3   : > { %3326 = vmatprep.subr.bf16.mxu0 %v3936_v15 }
 0x9f5   : > { %3317 = vmatmul.mubr.msk.bf16.vlgmr.msra.gmra.mrb[16].mxu0 %vm1206_vm5, %v2010_v44  ;;  %v2119_v46 = vpop.permute.xlu0 %2118 }
 0x9f6   : > { %3327 = vmatpush3.bf16.msra.mxu0 %v2116_v26  ;;  %3330 = vmatprep.mubr.msk.bf16.mxu0 %vm3938_vm0, %v3936_v15 }
 0x9f7   : > { %3328 = vmatprep.subr.bf16.mxu0 %v3936_v15 }
 0x9fa   : > { %3329 = vmatpush3.bf16.msra.mxu0 %v2117_v45 }
 0x9fb   : > { %3340 = vmatprep.subr.bf16.mxu0 %v3936_v15 }
 0x9fd   : > { %3331 = vmatmul.mubr.msk.bf16.vlgmr.msra.gmra.mrb[20].mxu0 %vm1206_vm5, %v2119_v46 }
 0x9fe   : > { %3341 = vmatpush3.bf16.msra.mxu0 %v4588_v31  ;;  %3356 = vmatprep.mubr.msk.bf16.mxu0 %vm3938_vm0, %v3936_v15 }
 0x9ff   : > { %2068 = vrot.lane.b32.xlu1 %v4571_v27, %s3940_s4  ;;  %3342 = vmatprep.subr.bf16.mxu0 %v3936_v15 }
 0xa02   : > { %3343 = vmatpush3.bf16.msra.mxu0 %v4592_v18 }
 0xa03   : > { %2177 = vrot.lane.b32.xlu1 %v4571_v27, %s3941_s6  ;;  %3344 = vmatprep.subr.bf16.mxu0 %v3936_v15 }
 0xa06   : > { %3345 = vmatpush3.bf16.msra.mxu0 %v4601_v35 }
 0xa07   : > { %3346 = vmatprep.subr.bf16.mxu0 %v3936_v15 }
 0xa0a   : > { %3347 = vmatpush3.bf16.msra.mxu0 %v4608_v37 }
 0xa0b   : > { %3348 = vmatprep.subr.bf16.mxu0 %v3936_v15 }
 0xa0e   : > { %3349 = vmatpush3.bf16.msra.mxu0 %v4627_v63 }
 0xa0f   : > { %3350 = vmatprep.subr.bf16.mxu0 %v3936_v15 }
 0xa12   : > { %3351 = vmatpush3.bf16.msra.mxu0 %v4632_v0 }
 0xa13   : > { %3352 = vmatprep.subr.bf16.mxu0 %v3936_v15 }
 0xa16   : > { %3353 = vmatpush3.bf16.msra.mxu0 %v4637_v1 }
 0xa17   : > { %3354 = vmatprep.subr.bf16.mxu0 %v3936_v15 }
 0xa1a   : > { %3355 = vmatpush3.bf16.msra.mxu0 %v4643_v4 }
 0xa7b   : > { %v1845_v31 = vpop.xlane.xlu1 %1844 }
 0xa7c   : > { %3578 = vrcp.f32 %v1845_v31 }
 0xa7f   : > { %v2069_v44 = vpop.permute.xlu1 %2068 }
 0xa80   : > { %v2074_v31 = vsel %vm1269_vm6, %v2069_v44, 0  ;;  %v3532_v44 = vld [vmem:[%s4413_s5 + $0x64] ss:$8 sps:$4 sm:$0xff]  }
 0xa86   : > { %v3579_v18 = vpop.eup %3578 }
 0xa87   : > { %v1847_v35 = vmul.f32 %v3579_v18, %v3577_v25  ;;  %v2178_v18 = vpop.permute.xlu1 %2177 }
 0xa89   : > { %v1848_v37 = vpack.c.bf16 %v1847_v35, %v1847_v35 }
 0xa8b   : > { %3295 = vmatmul.mubr.msk.bf16.vlgmr.msra.gmra.mrb[32].mxu1 %vm1252_vm9, %v1848_v37 }
 0xa8c   : > { %3299 = vmatpush3.bf16.msra.mxu1 %v1896_v34  ;;  %3302 = vmatprep.mubr.msk.bf16.mxu1 %vm3938_vm0, %v3936_v15 }
 0xa8d   : > { %3300 = vmatprep.subr.bf16.mxu1 %v3936_v15 }
 0xa90   : > { %3301 = vmatpush3.bf16.msra.mxu1 %v1897_v40 }
 0xa91   : > { %3306 = vmatprep.subr.bf16.mxu1 %v3936_v15 }
 0xa93   : > { %3303 = vmatmul.mubr.msk.bf16.vlgmr.msra.gmra.mrb[36].mxu1 %vm1206_vm5, %v1900_v42 }
 0xa94   : > { %3308 = vmatprep.mubr.msk.bf16.mxu1 %vm3938_vm0, %v3936_v15 }
 0xac0   : > { %v4705_v47 = vpop.f32.mrb[12].mxu0 }
 0xac1   : > { %v3282_v19 = vpop.f32.mrb[13].mxu0 }
 0xac2   : > { %v1745_v33 = vpop.f32.mrb[14].mxu0  ;;  %v2183_v19 = vsel %vm1269_vm6, %v2178_v18, 0  ;;  %v3537_v18 = vld [vmem:[%s4415_s11] sm:$0xff]  }
 0xac3   : > { %v3283_v34 = vpop.f32.mrb[15].mxu0 }
 0xac8   : > { %v2048_v48 = vpop.f32.mrb[16].mxu0 }
 0xac9   : > { %v3318_v49 = vpop.f32.mrb[17].mxu0  ;;  %v2054_v58 = vmul.f32 0.17677669, %v2048_v48 }
 0xaca   : > { %v2051_v50 = vpop.f32.mrb[18].mxu0 }
 0xacb   : > { %v3319_v51 = vpop.f32.mrb[19].mxu0  ;;  %v2055_v4 = vsel %vm4619_vm11, -1e+09, %v2054_v58  ;;  %v3053_v58 = vld [vmem:[%s4963_s14] ss:$0 sm:$0xff] }
 0xacc   : > { %v2056_v6 = vsel %vm1252_vm9, %v2055_v4, -inf }
 0xad0   : > { %v2157_v52 = vpop.f32.mrb[20].mxu0 }
 0xad1   : > { %v3332_v53 = vpop.f32.mrb[21].mxu0  ;;  %v2163_v1 = vmul.f32 0.17677669, %v2157_v52 }
 0xad2   : > { %v2160_v36 = vpop.f32.mrb[22].mxu0 }
 0xad3   : > { %v3333_v38 = vpop.f32.mrb[23].mxu0  ;;  %v2164_v7 = vsel %vm4619_vm11, -1e+09, %v2163_v1 }
 0xad4   : > { %v2165_v8 = vsel %vm1252_vm9, %v2164_v7, -inf }
 0xb5e   : > { %v4707_v40 = vpop.f32.mrb[32].mxu1 }
 0xb5f   : > { %v3296_v54 = vpop.f32.mrb[33].mxu1 }
 0xb60   : > { %v1893_v55 = vpop.f32.mrb[34].mxu1 }
 0xb61   : > { %v3297_v56 = vpop.f32.mrb[35].mxu1 }
 0xb66   : > { %v1938_v57 = vpop.f32.mrb[36].mxu1 }
 0xb67   : > { %v1944_v59 = vmul.f32 0.17677669, %v1938_v57  ;;  %v3304_v60 = vpop.f32.mrb[37].mxu1 }
 0xb68   : > { %v1941_v61 = vpop.f32.mrb[38].mxu1 }
 0xb69   : > { %v3305_v62 = vpop.f32.mrb[39].mxu1  ;;  %v1945_v63 = vsel %vm4619_vm11, -1e+09, %v1944_v59 }
 0xb6a   : > { %v1946_v0 = vsel %vm1252_vm9, %v1945_v63, -inf }
 0xb6b   : > { %1947 = vmax.xlane.f32.xlu0 %v1946_v0 }
 0xb6f   : > { %2057 = vmax.xlane.f32.xlu0 %v2056_v6 }
 0xb73   : > { %2166 = vmax.xlane.f32.xlu0 %v2165_v8  ;;  %v3601_v8 = vld [vmem:[#allocation2 + $0x8] sm:$0xff] }
 0xbf8   : > { %v1948_v9 = vpop.xlane.xlu0 %1947 }
 0xbf9   : > { %v1949_v10 = vsub.f32 %v1945_v63, %v1948_v9 }
 0xbfb   : > { %v1950_v14 = vmul.f32 1.442695, %v1949_v10 }
 0xbfc   : > { %v2058_v32 = vpop.xlane.xlu0 %2057 }
 0xbfd   : > { %v2059_v22 = vsub.f32 %v2055_v4, %v2058_v32 }
 0xbff   : > { %v2060_v11 = vmul.f32 1.442695, %v2059_v22 }
 0xc00   : > { %v2167_v12 = vpop.xlane.xlu0 %2166 }
 0xc01   : > { %3580 = vpow2.f32 %v2060_v11  ;;  %v2168_v13 = vsub.f32 %v2164_v7, %v2167_v12 }
 0xc03   : > { %v2169_v16 = vmul.f32 1.442695, %v2168_v13 }
 0xc05   : > { %3582 = vpow2.f32 %v2169_v16 }
 0xc06   : > { %3584 = vpow2.f32 %v1950_v14 }
 0xc0b   : > { %v3581_v17 = vpop.eup %3580 }
 0xc0c   : > { %v2062_v20 = vsel %vm1252_vm9, %v3581_v17, 0.0 }
 0xc0d   : > { %2063 = vadd.xlane.f32.xlu0 %v2062_v20  ;;  %v3514_v20 = vld [vmem:[%s4413_s5 + $0x4] ss:$8 sps:$4 sm:$0xff]  }
 0xc0f   : > { %v3583_v39 = vpop.eup %3582 }
 0xc10   : > { %v2171_v21 = vsel %vm1252_vm9, %v3583_v39, 0.0  ;;  %v3585_v23 = vpop.eup %3584 }
 0xc11   : > { %2172 = vadd.xlane.f32.xlu0 %v2171_v21  ;;  %v1952_v24 = vsel %vm1252_vm9, %v3585_v23, 0.0  ;;  %v3517_v21 = vld [vmem:[%s4413_s5 + $0x14] ss:$8 sps:$4 sm:$0xff]  }
 0xc15   : > { %1953 = vadd.xlane.f32.xlu0 %v1952_v24  ;;  %v3520_v24 = vld [vmem:[%s4413_s5 + $0x24] ss:$8 sps:$4 sm:$0xff]  }
 0xc2b   : > { %1959 = vrot.lane.b32.xlu0 %v4571_v27, %s3939_s3 }
 0xc9a   : > { %v2064_v25 = vpop.xlane.xlu0 %2063 }
 0xc9e   : > { %v2173_v28 = vpop.xlane.xlu0 %2172 }
 0xca2   : > { %v1954_v30 = vpop.xlane.xlu0 %1953 }
 0xca3   : > { %3586 = vrcp.f32 %v1954_v30  ;;  %v3521_v30 = vld [vmem:[%s4413_s5 + $0x30] ss:$8 sps:$4 sm:$0xff]  }
 0xca4   : > { %3588 = vrcp.f32 %v2064_v25  ;;  %v3518_v25 = vld [vmem:[%s4413_s5 + $0x20] ss:$8 sps:$4 sm:$0xff]  }
 0xca5   : > { %3590 = vrcp.f32 %v2173_v28  ;;  %v3523_v28 = vld [vmem:[%s4413_s5 + $0x34] ss:$8 sps:$4 sm:$0xff]  }
 0xca6   : > { %v1960_v41 = vpop.permute.xlu0 %1959 }
 0xca7   : > { %v1965_v42 = vsel %vm1269_vm6, %v1960_v41, 0  ;;  %v3524_v41 = vld [vmem:[%s4413_s5 + $0x40] ss:$8 sps:$4 sm:$0xff]  }
 0xca8   : > { %3307 = vmatpush3.bf16.msra.mxu1 %v1965_v42  ;;  %v3526_v42 = vld [vmem:[%s4413_s5 + $0x44] ss:$8 sps:$4 sm:$0xff]  }
 0xca9   : > { %3320 = vmatprep.subr.bf16.mxu1 %v3936_v15 }
 0xcad   : > { %v3587_v26 = vpop.eup %3586 }
 0xcae   : > { %v1956_v43 = vmul.f32 %v3587_v26, %v3585_v23  ;;  %v3589_v46 = vpop.eup %3588  ;;  %v3515_v23 = vld [vmem:[%s4413_s5 + $0x10] ss:$8 sps:$4 sm:$0xff]   ;;  %v3529_v26 = vld [vmem:[%s4413_s5 + $0x54] ss:$8 sps:$4 sm:$0xff]  }
 0xcaf   : > { %v2066_v27 = vmul.f32 %v3589_v46, %v3581_v17  ;;  %v3591_v37 = vpop.eup %3590  ;;  %v3535_v46 = vld [vmem:[%s4413_s5 + $0x74] ss:$8 sps:$4 sm:$0xff]  }
 0xcb0   : > { %v1957_v45 = vpack.c.bf16 %v1956_v43, %v1956_v43  ;;  %v2175_v33 = vmul.f32 %v3591_v37, %v3583_v39  ;;  %v3512_v39 = vld [vmem:[%s4413_s5] ss:$8 sps:$4 sm:$0xff]   ;;  %v3527_v43 = vld [vmem:[%s4413_s5 + $0x50] ss:$8 sps:$4 sm:$0xff]  }
 0xcb1   : > { %v2067_v35 = vpack.c.bf16 %v2066_v27, %v2066_v27  ;;  %v3536_v27 = vld [vmem:[%s4415_s11 + $0x40] sm:$0xff]   ;;  %v3539_v37 = vld [vmem:[%s4415_s11 + $0x8] sm:$0xff]  }
 0xcb2   : > { %3309 = vmatmul.mubr.msk.bf16.vlgmr.msra.gmra.mrb[40].mxu1 %vm1252_vm9, %v1957_v45  ;;  %v2176_v34 = vpack.c.bf16 %v2175_v33, %v2175_v33  ;;  %v3530_v45 = vld [vmem:[%s4413_s5 + $0x60] ss:$8 sps:$4 sm:$0xff]   ;;  %3166 = vmatprep.subr.bf16.mxu0 %v3536_v27  ;;  %v3541_v33 = vld [vmem:[%s4415_s11 + $0x10] sm:$0xff]  }
 0xcb3   : > { %3321 = vmatpush3.bf16.msra.mxu1 %v2074_v31  ;;  %3322 = vmatprep.mubr.msk.bf16.mxu1 %vm3938_vm0, %v3936_v15  ;;  %v3533_v31 = vld [vmem:[%s4413_s5 + $0x70] ss:$8 sps:$4 sm:$0xff]  }
 0xcb4   : > { %3334 = vmatprep.subr.bf16.mxu1 %v3936_v15 }
 0xcba   : > { %3323 = vmatmul.mubr.msk.bf16.vlgmr.msra.gmra.mrb[44].mxu1 %vm1252_vm9, %v2067_v35  ;;  %v3538_v35 = vld [vmem:[%s4415_s11 + $0x48] sm:$0xff]  }
 0xcbb   : > { %3335 = vmatpush3.bf16.msra.mxu1 %v2183_v19  ;;  %3336 = vmatprep.mubr.msk.bf16.mxu1 %vm3938_vm0, %v3936_v15  ;;  %v3540_v19 = vld [vmem:[%s4415_s11 + $0x50] sm:$0xff]  }
 0xcbc   : > { %2455 = vmatprep.subr.bf16.mxu1 %v3514_v20  ;;  %v2363_v20 = vld [vmem:[%s4402_s10] sm:$0x3] }
 0xcc2   : > { %3337 = vmatmul.mubr.msk.bf16.vlgmr.msra.gmra.mrb[48].mxu1 %vm1252_vm9, %v2176_v34  ;;  %v3542_v34 = vld [vmem:[%s4415_s11 + $0x58] sm:$0xff]  }
 0xcc3   : > { %2487 = vmatprep.mubr.bf16.mxu1 %v3937_v29  ;;  %v3600_v29 = vld [vmem:[#allocation2] sm:$0xff]  ;;  %2456 = vmatpush1.bf16.msra.mxu1 %v3512_v39  ;;  %v2368_v39 = vrot.slane %v2363_v20, %v4479_v5 }
 0xcc4   : > { %v2281_v57 = vadd.f32 %v3600_v29, %v4705_v47  ;;  %2457 = vmatprep.subr.bf16.mxu1 %v3517_v21  ;;  %v2372_v21 = vrot.slane %v2363_v20, %v926_v3 }
 0xcc6   : > { %v4745_v59 = vadd.f32 %v3053_v58, %v2281_v57 }
 0xcc7   : > { %2458 = vmatpush1.bf16.msra.mxu1 %v3515_v23 }
 0xcc8   : > { %2459 = vmatprep.subr.bf16.mxu1 %v3520_v24 }
 0xccb   : > { %2460 = vmatpush1.bf16.msra.mxu1 %v3518_v25 }
 0xccc   : > { %2461 = vmatprep.subr.bf16.mxu1 %v3523_v28 }
 0xccf   : > { %2462 = vmatpush1.bf16.msra.mxu1 %v3521_v30 }
 0xcd0   : > { %2463 = vmatprep.subr.bf16.mxu1 %v3526_v42 }
 0xcd3   : > { %2464 = vmatpush1.bf16.msra.mxu1 %v3524_v41 }
 0xcd4   : > { %2465 = vmatprep.subr.bf16.mxu1 %v3529_v26 }
 0xcd7   : > { %2466 = vmatpush1.bf16.msra.mxu1 %v3527_v43 }
 0xcd8   : > { %2467 = vmatprep.subr.bf16.mxu1 %v3532_v44 }
 0xcdb   : > { %2468 = vmatpush1.bf16.msra.mxu1 %v3530_v45 }
 0xcdc   : > { %2469 = vmatprep.subr.bf16.mxu1 %v3535_v46 }
 0xcdf   : > { %2470 = vmatpush1.bf16.msra.mxu1 %v3533_v31 }
 0xd85   : > { %v2001_v48 = vpop.f32.mrb[40].mxu1 }
 0xd86   : > { %2226 = vrot.lane.b32.xlu0 %v2001_v48, %s3941_s6  ;;  %v3310_v49 = vpop.f32.mrb[41].mxu1  ;;  %v3543_v48 = vld [vmem:[%s4415_s11 + $0x18] sm:$0xff]  }
 0xd87   : > { %v2004_v50 = vpop.f32.mrb[42].mxu1  ;;  %v3544_v49 = vld [vmem:[%s4415_s11 + $0x60] sm:$0xff]  }
 0xd88   : > { %v3311_v51 = vpop.f32.mrb[43].mxu1  ;;  %v3545_v50 = vld [vmem:[%s4415_s11 + $0x20] sm:$0xff]  }
 0xd89   : > { %v3546_v51 = vld [vmem:[%s4415_s11 + $0x68] sm:$0xff]  }
 0xd8d   : > { %v2110_v52 = vpop.f32.mrb[44].mxu1 }
 0xd8e   : > { %2230 = vrot.lane.b32.xlu1 %v2110_v52, %s3940_s4  ;;  %v3324_v53 = vpop.f32.mrb[45].mxu1 }
 0xd8f   : > { %v2113_v36 = vpop.f32.mrb[46].mxu1 }
 0xd90   : > { %v3325_v38 = vpop.f32.mrb[47].mxu1 }
 0xd95   : > { %v2219_v15 = vpop.f32.mrb[48].mxu1 }
 0xd96   : > { %2234 = vrot.lane.b32.xlu0 %v2219_v15, %s3939_s3  ;;  %v3338_v54 = vpop.f32.mrb[49].mxu1 }
 0xd97   : > { %v2222_v55 = vpop.f32.mrb[50].mxu1 }
 0xd98   : > { %v3339_v56 = vpop.f32.mrb[51].mxu1 }
 0xdb2   : > { %2294 = vadd.xlane.f32.xlu1 %v4745_v59 }
 0xdf8   : > { %v2227_v60 = vpop.permute.xlu0 %2226 }
 0xdf9   : > { %v2237_v62 = vsel %vm1206_vm5, %v4707_v40, %v2227_v60 }
 0xe00   : > { %v2231_v61 = vpop.permute.xlu1 %2230 }
 0xe01   : > { %v2238_v63 = vsel %vm1655_vm12, %v2237_v62, %v2231_v61 }
 0xe08   : > { %v2235_v0 = vpop.permute.xlu0 %2234 }
 0xe09   : > { %v2239_v1 = vsel %vm1657_vm13, %v2238_v63, %v2235_v0 }
 0xe0a   : > { %v2240_v47 = vpack.c.bf16 %v2239_v1, %v2239_v1  ;;  %v3054_v1 = vld [vmem:[%s807_s27] ss:$0 sm:$0xff] }
 0xe0c   : > { %3357 = vmatmul.mubr.bf16.vlgmr.msra.gmra.mrb[24].mxu0 %v2240_v47 }
 0xe0d   : > { %3167 = vmatpush3.bf16.msra.mxu0 %v3537_v18 }
 0xe0e   : > { %3168 = vmatprep.subr.bf16.mxu0 %v3538_v35  ;;  %v3088_v35 = vld [vmem:[%s817_s23] ss:$0 sm:$0xff] }
 0xe11   : > { %3169 = vmatpush3.bf16.msra.mxu0 %v3539_v37 }
 0xe12   : > { %3170 = vmatprep.subr.bf16.mxu0 %v3540_v19 }
 0xe15   : > { %3171 = vmatpush3.bf16.msra.mxu0 %v3541_v33 }
 0xe16   : > { %3172 = vmatprep.subr.bf16.mxu0 %v3542_v34 }
 0xe19   : > { %3173 = vmatpush3.bf16.msra.mxu0 %v3543_v48 }
 0xe1a   : > { %3174 = vmatprep.subr.bf16.mxu0 %v3544_v49 }
 0xe1d   : > { %3175 = vmatpush3.bf16.msra.mxu0 %v3545_v50 }
 0xe1e   : > { %3176 = vmatprep.subr.bf16.mxu0 %v3546_v51 }
 0xe3f   : > { %v2295_v4 = vpop.xlane.xlu1 %2294 }
 0xe40   : > { %v2298_v6 = vmul.f32 0.0078125, %v2295_v4 }
 0xe42   : > { %v4753_v10 = vsub.f32 %v4745_v59, %v2298_v6 }
 0xe44   : > { %v2302_v12 = vmul.f32 %v4753_v10, %v4753_v10  ;;  %v2330_v4 = vmul.f32 %v3054_v1, %v4753_v10  ;;  %v3548_v10 = vld [vmem:[%s4415_s11 + $0x70] sm:$0xff]  }
 0xedf   : > { %v2275_v7 = vpop.f32.mrb[24].mxu0 }
 0xee0   : > { %v2282_v9 = vadd.f32 %v3601_v8, %v2275_v7  ;;  %v3358_v32 = vpop.f32.mrb[25].mxu0 }
 0xee1   : > { %v2278_v22 = vpop.f32.mrb[26].mxu0 }
 0xee2   : > { %v4755_v40 = vadd.f32 %v3053_v58, %v2282_v9  ;;  %v3359_v11 = vpop.f32.mrb[27].mxu0  ;;  %v3055_v9 = vld [vmem:[%s810_s8] ss:$0 sm:$0xff] }
 0xee4   : > { %2296 = vadd.xlane.f32.xlu0 %v4755_v40 }
 0xee8   : > { %2304 = vadd.xlane.f32.xlu0 %v2302_v12 }
 0xf71   : > { %v2297_v13 = vpop.xlane.xlu0 %2296 }
 0xf72   : > { %v2299_v14 = vmul.f32 0.0078125, %v2297_v13  ;;  %v3547_v13 = vld [vmem:[%s4415_s11 + $0x28] sm:$0xff]  }
 0xf73   : > { %3177 = vmatpush3.bf16.msra.mxu0 %v3547_v13 }
 0xf74   : > { %v4761_v16 = vsub.f32 %v4755_v40, %v2299_v14  ;;  %v3549_v14 = vld [vmem:[%s4415_s11 + $0x30] sm:$0xff]   ;;  %3178 = vmatprep.subr.bf16.mxu0 %v3548_v10 }
 0xf75   : > { %v2305_v52 = vpop.xlane.xlu0 %2304 }
 0xf76   : > { %v2303_v17 = vmul.f32 %v4761_v16, %v4761_v16  ;;  %v2308_v53 = vmul.f32 0.007874016, %v2305_v52  ;;  %v2331_v6 = vmul.f32 %v3054_v1, %v4761_v16  ;;  %v3550_v16 = vld [vmem:[%s4415_s11 + $0x78] sm:$0xff]  }
 0xf77   : > { %3179 = vmatpush3.bf16.msra.mxu0 %v3549_v14 }
 0xf78   : > { %2306 = vadd.xlane.f32.xlu1 %v2303_v17  ;;  %3592 = vrsqrt.f32 %v2308_v53  ;;  %vm2312_vm14 = vcmp.eq.f32.partialorder %v2308_v53, inf  ;;  %v2315_v56 = vand.u32 2147483648, %v2308_v53  ;;  %vm2314_vm15 = vcmp.eq.f32.partialorder %v2308_v53, 0.0  ;;  %v3551_v17 = vld [vmem:[%s4415_s11 + $0x38] sm:$0xff]   ;;  %3180 = vmatprep.subr.bf16.mxu0 %v3550_v16 }
 0xf7b   : > { %3181 = vmatpush3.bf16.msra.mxu0 %v3551_v17 }
 0xf82   : > { %v3593_v36 = vpop.eup %3592 }
 0xf83   : > { %v2311_v54 = vmul.f32 %v3593_v36, %v2308_v53 }
 0xf85   : > { %v2313_v55 = vsel %vm2312_vm14, %v2308_v53, %v2311_v54 }
 0xf86   : > { %v2316_v29 = vsel %vm2314_vm15, %v2315_v56, %v2313_v55 }
 0xf87   : > { %v2332_v57 = vadd.f32 1e-06, %v2316_v29 }
0x1005   : > { %v2307_v38 = vpop.xlane.xlu1 %2306 }
0x1006   : > { %v2309_v15 = vmul.f32 0.007874016, %v2307_v38 }
0x1008   : > { %3594 = vrsqrt.f32 %v2309_v15  ;;  %vm2319_vm0 = vcmp.eq.f32.partialorder %v2309_v15, inf  ;;  %v2322_v61 = vand.u32 2147483648, %v2309_v15  ;;  %vm2321_vm1 = vcmp.eq.f32.partialorder %v2309_v15, 0.0 }
0x1009   : > { %3596 = vrcp.f32 %v2332_v57 }
0x1012   : > { %v3595_v58 = vpop.eup %3594 }
0x1013   : > { %v2318_v60 = vmul.f32 %v3595_v58, %v2309_v15  ;;  %v3597_v47 = vpop.eup %3596 }
0x1014   : > { %v2335_v7 = vmul.f32 %v3597_v47, %v2330_v4 }
0x1015   : > { %v2320_v62 = vsel %vm2319_vm0, %v2309_v15, %v2318_v60 }
0x1016   : > { %v2323_v63 = vsel %vm2321_vm1, %v2322_v61, %v2320_v62  ;;  %v2344_v22 = vadd.f32 %v3055_v9, %v2335_v7  ;;  %v3090_v7 = vld [vmem:[%s4967_s20] ss:$0 sm:$0xff] (!%p3089_p8) }
0x1017   : > { %v2333_v0 = vadd.f32 1e-06, %v2323_v63 }
0x1019   : > { %3598 = vrcp.f32 %v2333_v0 }
0x1023   : > { %v3599_v8 = vpop.eup %3598 }
0x1024   : > { %v2337_v32 = vmul.f32 %v3599_v8, %v2331_v6 }
0x1026   : > { %v2345_v11 = vadd.f32 %v3055_v9, %v2337_v32  ;;  %v3091_v32 = vld [vmem:[%s4968_s30] ss:$0 sm:$0xff] (!%p3089_p8) }
0x1028   : > { %v2346_v12 = vpack.c.bf16 %v2345_v11, %v2344_v22 }
0x102a   : > { %2488 = vmatmul.mubr.bf16.vlgmr.msra.gmra.mrb[52].mxu1 %v2346_v12 }
0x10fd   : > { %v2489_v23 = vpop.f32.mrb[52].mxu1 }
0x10fe   : > { %v2490_v24 = vadd.f32 %v2489_v23, %v2368_v39  ;;  %v2491_v25 = vpop.f32.mrb[53].mxu1 }
0x10ff   : > { %v2492_v28 = vadd.f32 %v2491_v25, %v2372_v21  ;;  %v2493_v30 = vpop.f32.mrb[54].mxu1 }
0x1100   : > { %v2494_v41 = vadd.f32 %v2493_v30, %v2368_v39  ;;  %v2495_v42 = vpop.f32.mrb[55].mxu1  ;;  %v2498_v43 = vmax.f32 %v2490_v24, 0.0 }
0x1101   : > { %v2496_v26 = vadd.f32 %v2495_v42, %v2372_v21  ;;  %v2499_v45 = vmax.f32 %v2492_v28, 0.0 }
0x1102   : > { %v2500_v44 = vmax.f32 %v2494_v41, 0.0 }
0x1103   : > { %v2501_v46 = vmax.f32 %v2496_v26, 0.0 }
0x1104   : > { %v2502_v31 = vpack.c.bf16 %v2500_v44, %v2498_v43 }
0x1105   : > { %v2503_v27 = vpack.c.bf16 %v2501_v46, %v2499_v45 }
0x1107   : > { %2664 = vmatprep.mubr.bf16.mxu0 %v2503_v27 }
0x1108   : > { %2665 = vmatmul.mubr.bf16.vlgmr.msra.gmra.mrb[28].mxu0 %v2502_v31 }
0x11db   : > { %v3182_v5 = vpop.f32.mrb[28].mxu0 }
0x11dc   : > { %v3183_v2 = vpop.f32.mrb[29].mxu0 }
0x11dd   : > { %v3184_v3 = vadd.f32 %v3183_v2, %v3182_v5  ;;  %v3185_v18 = vpop.f32.mrb[30].mxu0 }
0x11de   : > { %v3186_v37 = vpop.f32.mrb[31].mxu0 }
0x11df   : > { %v2673_v19 = vadd.f32 %v3184_v3, %v4745_v59  ;;  %v3187_v33 = vadd.f32 %v3186_v37, %v3185_v18  ;;  %2689 = sbr.rel (%p3089_p8) target bundleno = 4908 (0x132c), region = 124 }
0x11e1   : > { %v2682_v34 = vadd.f32 %v3088_v35, %v2673_v19  ;;  %v2674_v48 = vadd.f32 %v3187_v33, %v4755_v40 }
0x11e3   : > { %2684 = vst [vmem:[#allocation2] sm:$0xff] %v2682_v34  ;;  %v2683_v49 = vadd.f32 %v3088_v35, %v2674_v48  ;;  %2692 = vadd.xlane.f32.xlu0 (!%p3089_p8), %v2682_v34 }
0x11e5   : > { %2685 = vst [vmem:[#allocation2 + $0x8] sm:$0xff] %v2683_v49 }
0x11e7   : > { %2694 = vadd.xlane.f32.xlu0 %v2683_v49 }
0x1270   : > { %v2693_v50 = vpop.xlane.xlu0 %2692 }
0x1271   : > { %v2696_v51 = vmul.f32 0.0078125, %v2693_v50 }
0x1273   : > { %v2698_v52 = vsub.f32 %v2682_v34, %v2696_v51 }
0x1274   : > { %v2695_v53 = vpop.xlane.xlu0 %2694 }
0x1275   : > { %v2697_v36 = vmul.f32 0.0078125, %v2695_v53  ;;  %v2700_v38 = vmul.f32 %v2698_v52, %v2698_v52  ;;  %v2728_v8 = vmul.f32 %v3090_v7, %v2698_v52 }
0x1277   : > { %v2699_v15 = vsub.f32 %v2683_v49, %v2697_v36  ;;  %2702 = vadd.xlane.f32.xlu1 %v2700_v38 }
0x1279   : > { %v2701_v59 = vmul.f32 %v2699_v15, %v2699_v15  ;;  %v2729_v11 = vmul.f32 %v3090_v7, %v2699_v15 }
0x127b   : > { %2704 = vadd.xlane.f32.xlu1 %v2701_v59 }
0x1304   : > { %v2703_v54 = vpop.xlane.xlu1 %2702 }
0x1305   : > { %v2706_v40 = vmul.f32 0.007874016, %v2703_v54 }
0x1307   : > { %3602 = vrsqrt.f32 %v2706_v40  ;;  %vm2710_vm2 = vcmp.eq.f32.partialorder %v2706_v40, inf  ;;  %v2713_v58 = vand.u32 2147483648, %v2706_v40  ;;  %vm2712_vm3 = vcmp.eq.f32.partialorder %v2706_v40, 0.0 }
0x1308   : > { %v2705_v55 = vpop.xlane.xlu1 %2704 }
0x1309   : > { %v2707_v56 = vmul.f32 0.007874016, %v2705_v55 }
0x130b   : > { %3604 = vrsqrt.f32 %v2707_v56  ;;  %vm2717_vm4 = vcmp.eq.f32.partialorder %v2707_v56, inf  ;;  %v2720_v1 = vand.u32 2147483648, %v2707_v56  ;;  %vm2719_vm5 = vcmp.eq.f32.partialorder %v2707_v56, 0.0 }
0x1311   : > { %v3603_v29 = vpop.eup %3602 }
0x1312   : > { %v2709_v57 = vmul.f32 %v3603_v29, %v2706_v40 }
0x1314   : > { %v2711_v60 = vsel %vm2710_vm2, %v2706_v40, %v2709_v57 }
0x1315   : > { %v3605_v61 = vpop.eup %3604  ;;  %v2714_v62 = vsel %vm2712_vm3, %v2713_v58, %v2711_v60 }
0x1316   : > { %v2730_v63 = vadd.f32 1e-06, %v2714_v62  ;;  %v2716_v0 = vmul.f32 %v3605_v61, %v2707_v56 }
0x1318   : > { %3606 = vrcp.f32 %v2730_v63  ;;  %v2718_v47 = vsel %vm2717_vm4, %v2707_v56, %v2716_v0 }
0x1319   : > { %v2721_v4 = vsel %vm2719_vm5, %v2720_v1, %v2718_v47 }
0x131a   : > { %v2731_v6 = vadd.f32 1e-06, %v2721_v4 }
0x131c   : > { %3608 = vrcp.f32 %v2731_v6 }
0x1322   : > { %v3607_v9 = vpop.eup %3606 }
0x1323   : > { %v2733_v22 = vmul.f32 %v3607_v9, %v2728_v8 }
0x1325   : > { %v2742_v12 = vadd.f32 %v3091_v32, %v2733_v22 }
0x1326   : > { %v3609_v13 = vpop.eup %3608 }
0x1327   : > { %2744 = vst [vmem:[#allocation14] sm:$0xff] %v2742_v12  ;;  %v2735_v10 = vmul.f32 %v3609_v13, %v2729_v11 }
0x1329   : > { %v2743_v14 = vadd.f32 %v3091_v32, %v2735_v10 }
0x132b   : > { %2745 = vst [vmem:[#allocation14 + $0x8] sm:$0xff] %v2743_v14 }
0x132c PF: > { %p3419_p2 = scmp.eq.s32.totalorder %s4049_s25, 1  ;;  %s3942_s18 = smov [#allocation14]  }
0x132d   : > { %s2752_s21 = sshll.u32 %s3942_s18, 4  ;;  %s2753_s21 = int_to_ptr.vmem [resolvable:$true] %s2752_s21 }
0x132e   : > { %s3846_s5 = scalar_lea.vmem %s2753_s21, 256  ;;  %p3853_p0 = scmp.lt.s32.totalorder %s2753_s21, %s2753_s21 }
0x132f   : > { %p3847_p9 = scmp.ne.s32.totalorder %s2753_s21, %s3846_s5  ;;  %p3854_p6 = scmp.lt.s32.totalorder %s3846_s5, %s3846_s5 }
0x1331   : > { %p3848_p11 = pnand %p3847_p9, %p3419_p2  ;;  %p3855_p7 = por %p3854_p6, %p3853_p0 }
0x1333   : > { %p3849_p13 = pneg %p3848_p11 }
0x1335   : > { %p3856_p5 = pnand %p3855_p7, %p3849_p13 }
0x1337   : > { %3859 = shalt.err (!%p3856_p5)
}
0x1338   : > { %s4969_s3 = sld [smem:[#allocation36_spill]] }
0x133e   : > { %s3860_s4 = scalar_lea.hbm %s4969_s3, 256 }
0x133f   : > { %p3861_p1 = scmp.ne.s32.totalorder %s4969_s3, %s3860_s4  ;;  %p3866_p12 = scmp.lt.u32.totalorder %s3860_s4, %s4969_s3 }
0x1341   : > { %p3862_p3 = pnand %p3861_p1, %p3419_p2 }
0x1343   : > { %p3863_p10 = pneg %p3862_p3 }
0x1345   : > { %p3868_p4 = pnand %p3866_p12, %p3863_p10 }
0x1347   : > { %3871 = shalt.err (!%p3868_p4)
}
0x1348   : > { %s3943_s15 = smov 128   ;;  %s3944_s29 = smov 8  }
0x1349   : > { %3385 = dma.vmem_to_hbm [thread:$0]  (%p3419_p2), %s2753_s21, 256, %s4969_s3, [#allocation5], %s3943_s15, %s3943_s15, %s3944_s29  }
0x134a   : > { %3901 = dma.done.wait (%p3419_p2), [#allocation5], 256  }
0x134b   : > { %3903 = vsyncadd (%p3419_p2), [#allocation5], 4294967040 }
0x134c PF: > { %s4970_s24 = sld [smem:[#allocation20_spill]]  ;;  %s4971_s16 = sld [smem:[#allocation19_spill]] }
0x134d   : > { %s4972_s23 = sld [smem:[#allocation21_spill]]  ;;  %s4973_s21 = smov %s3910_s22 }
0x1352   : > { %p26_p8 = scmp.ge.s32.totalorder %s4970_s24, 4   ;;  %s4974_s22 = smov %s4971_s16 }
0x1354   :  { %28 = sbr.rel (!%p26_p8) target bundleno = 20 (0x14), region = 210 }
0x135b   :  { %2768 = vsyncpa [#allocation4], 1 }
0x135c   :  { %2770 = vsyncpa [#allocation4 + $0x1], 1 }
0x135d   :  { %2771 = vsyncpa [#allocation7], 1 }
0x135e   :  { %2772 = vsyncpa [#allocation5], 1 }
0x135f   :  { %2774 = vsyncpa [#allocation5 + $0x1], 1 }

</bundles_post_ra>
